<compile_context>
chip_gen: v6e
topology: v6e:2x2x1
jax: 0.10.0
libtpu: 0.0.40
codegen_flags: <defaults>
</compile_context>

<pallas_src>
import functools

import jax
import jax.numpy as jnp
from jax.experimental import pallas as pl
from jax.experimental.pallas import tpu as pltpu


# TODO(synk): the bilinear x2 upsample stays in JAX glue (static gather + lerp);
# fusing it into the conv kernel would remove the remaining HBM round-trip of u.
def upsample_bilinear_x2_align_corners(x_nhwc):
    n, h, w, c = x_nhwc.shape
    h2, w2 = 2 * h, 2 * w

    def src_coords(out_sz, in_sz):
        if in_sz == 1:
            return jnp.zeros((out_sz,), jnp.float32)
        return jnp.arange(out_sz, dtype=jnp.float32) * (in_sz - 1) / (out_sz - 1)

    sh = src_coords(h2, h)
    sw = src_coords(w2, w)
    h0 = jnp.floor(sh).astype(jnp.int32)
    h1 = jnp.minimum(h0 + 1, h - 1)
    fh = sh - h0.astype(jnp.float32)
    w0 = jnp.floor(sw).astype(jnp.int32)
    w1 = jnp.minimum(w0 + 1, w - 1)
    fw = sw - w0.astype(jnp.float32)

    xh = (x_nhwc[:, h0, :, :] * (1.0 - fh)[None, :, None, None]
          + x_nhwc[:, h1, :, :] * fh[None, :, None, None])
    u = (xh[:, :, w0, :] * (1.0 - fw)[None, None, :, None]
         + xh[:, :, w1, :] * fw[None, None, :, None])
    return u


# ----------------------------------------------------------------------------
# Pallas kernel 1: row-tiled 3x3 conv + bias, with fused partial BN statistics.
#   u_ref : (1, H2, W2+2, Cin)      upsampled input, W already zero-padded by 1
#   w_ref : (Kp, Cout_pad)          taps, row index = (ky*3+kx)*Cin + ci
#   b_ref : (1, Cout_pad)
#   y_ref : (1, 1, TILE_H*W2, Cout_pad)   conv output tile (lane-dense)
#   s1/s2 : (1, 1, 1, Cout_pad)     per-tile channel sum / sum of squares
# ----------------------------------------------------------------------------
def conv3x3_kernel(u_ref, w_ref, b_ref, y_ref, s1_ref, s2_ref, *,
                   H2, W2, Cin, Kp, TILE_H, NT):
    t = pl.program_id(1)
    h0 = t * TILE_H

    # Rows [h0-1, h0+TILE_H+1); rows outside [0, H2) are zero (conv pad=1 in H).
    top = u_ref[0, pl.ds(jnp.maximum(h0 - 1, 0), 1), :, :]
    top = top * (t > 0).astype(jnp.float32)
    mid = u_ref[0, pl.ds(h0, TILE_H), :, :]
    bot = u_ref[0, pl.ds(jnp.minimum(h0 + TILE_H, H2 - 1), 1), :, :]
    bot = bot * (t < NT - 1).astype(jnp.float32)
    xt = jnp.concatenate([top, mid, bot], axis=0)          # (TILE_H+2, W2+2, Cin)

    # im2col slab -> single MXU dot (K = 9*Cin zero-padded to Kp).
    pieces = [xt[ky:ky + TILE_H, kx:kx + W2, :]
              for ky in range(3) for kx in range(3)]
    if Kp > 9 * Cin:
        pieces.append(jnp.zeros((TILE_H, W2, Kp - 9 * Cin), jnp.float32))
    im2col = jnp.concatenate(pieces, axis=-1)               # (TILE_H, W2, Kp)
    im2col = im2col.reshape(TILE_H * W2, Kp)

    acc = jnp.dot(im2col, w_ref[...], preferred_element_type=jnp.float32)
    acc = acc + b_ref[...]                                  # (1, Cp) broadcast

    y_ref[0, 0, :, :] = acc
    s1_ref[0, 0, :, :] = jnp.sum(acc, axis=0, keepdims=True)
    s2_ref[0, 0, :, :] = jnp.sum(acc * acc, axis=0, keepdims=True)


# ----------------------------------------------------------------------------
# Pallas kernel 2: fused BatchNorm (precomputed scale/shift) + ReLU, row-tiled,
# writing in place over the conv output.
# ----------------------------------------------------------------------------
def bn_relu_kernel(y_ref, sc_ref, sh_ref, o_ref):
    y = y_ref[0, 0, :, :]
    o_ref[0, 0, :, :] = jnp.maximum(y * sc_ref[...] + sh_ref[...], 0.0)


def _pick_tile_h(H2, W2, Cp):
    budget = 1 << 20          # keep each output block <= ~1 MiB (v7x-friendly)
    cap = max(H2 // 4, 1)     # prefer >= 4 row tiles so the grid pipelines /
                              # shards across TensorCores
    best = 1
    for d in range(1, H2 + 1):
        if H2 % d == 0 and d <= cap and d * W2 * Cp * 4 <= budget:
            best = d
    return best


# ----------------------------------------------------------------------------
# Wrapper: full up_conv forward
# ----------------------------------------------------------------------------
def up_conv_forward(x_nchw, conv_w, conv_b, bn_gamma, bn_beta, eps=1e-5):
    N, Cin, H, W = x_nchw.shape
    Cout = conv_w.shape[0]
    H2, W2 = 2 * H, 2 * W
    Cp = ((Cout + 127) // 128) * 128          # lane-dense padded out channels
    Kp = ((9 * Cin + 127) // 128) * 128       # padded contraction dim

    TILE_H = _pick_tile_h(H2, W2, Cp)
    NT = H2 // TILE_H
    R = TILE_H * W2

    # NCHW -> NHWC; upsample; pad W only (fuses with the upsample producer).
    x = jnp.transpose(x_nchw, (0, 2, 3, 1)).astype(jnp.float32)
    u = upsample_bilinear_x2_align_corners(x)                 # (N, H2, W2, Cin)
    u = jnp.pad(u, ((0, 0), (0, 0), (1, 1), (0, 0)))          # (N, H2, W2+2, Cin)

    # conv weight (Cout,Cin,3,3) -> (ky,kx,ci,co) -> (9*Cin, Cout) -> (Kp, Cp)
    w_km = jnp.transpose(conv_w, (2, 3, 1, 0)).reshape(9 * Cin, Cout)
    w_km = jnp.pad(w_km, ((0, Kp - 9 * Cin), (0, Cp - Cout))).astype(jnp.float32)
    b_row = jnp.pad(conv_b, (0, Cp - Cout)).reshape(1, Cp).astype(jnp.float32)

    conv_call = pl.pallas_call(
        functools.partial(conv3x3_kernel, H2=H2, W2=W2, Cin=Cin, Kp=Kp,
                          TILE_H=TILE_H, NT=NT),
        grid=(N, NT),
        out_shape=(
            jax.ShapeDtypeStruct((N, NT, R, Cp), jnp.float32),   # conv out
            jax.ShapeDtypeStruct((N, NT, 1, Cp), jnp.float32),   # channel sums
            jax.ShapeDtypeStruct((N, NT, 1, Cp), jnp.float32),   # channel sumsq
        ),
        in_specs=[
            pl.BlockSpec((1, H2, W2 + 2, Cin), lambda n, t: (n, 0, 0, 0)),
            pl.BlockSpec((Kp, Cp), lambda n, t: (0, 0)),
            pl.BlockSpec((1, Cp), lambda n, t: (0, 0)),
        ],
        out_specs=(
            pl.BlockSpec((1, 1, R, Cp), lambda n, t: (n, t, 0, 0)),
            pl.BlockSpec((1, 1, 1, Cp), lambda n, t: (n, t, 0, 0)),
            pl.BlockSpec((1, 1, 1, Cp), lambda n, t: (n, t, 0, 0)),
        ),
        compiler_params=pltpu.CompilerParams(
            dimension_semantics=("parallel", "parallel"),
            vmem_limit_bytes=48 * 1024 * 1024),
    )
    y, s1, s2 = conv_call(u, w_km, b_row)

    # BatchNorm2d training-mode batch stats from the kernel partial sums
    # (pad channels excluded); biased variance, matching PyTorch.
    count = float(N * H2 * W2)
    s1c = jnp.sum(s1[..., :Cout], axis=(0, 1, 2))
    s2c = jnp.sum(s2[..., :Cout], axis=(0, 1, 2))
    mean = s1c / count
    var = jnp.maximum(s2c / count - mean * mean, 0.0)
    scale = bn_gamma / jnp.sqrt(var + eps)
    shift = bn_beta - mean * scale
    scale_p = jnp.pad(scale, (0, Cp - Cout)).reshape(1, Cp).astype(jnp.float32)
    shift_p = jnp.pad(shift, (0, Cp - Cout)).reshape(1, Cp).astype(jnp.float32)

    bn_call = pl.pallas_call(
        bn_relu_kernel,
        grid=(N, NT),
        out_shape=jax.ShapeDtypeStruct((N, NT, R, Cp), jnp.float32),
        in_specs=[
            pl.BlockSpec((1, 1, R, Cp), lambda n, t: (n, t, 0, 0)),
            pl.BlockSpec((1, Cp), lambda n, t: (0, 0)),
            pl.BlockSpec((1, Cp), lambda n, t: (0, 0)),
        ],
        out_specs=pl.BlockSpec((1, 1, R, Cp), lambda n, t: (n, t, 0, 0)),
        input_output_aliases={0: 0},      # ReLU writes in place over conv out
        compiler_params=pltpu.CompilerParams(
            dimension_semantics=("parallel", "parallel"),
            vmem_limit_bytes=48 * 1024 * 1024),
    )
    o = bn_call(y, scale_p, shift_p)                          # (N, NT, R, Cp)

    out = o.reshape(N, H2, W2, Cp)[..., :Cout]
    return jnp.transpose(out, (0, 3, 1, 2))


# Pure-JAX reference (same upsample glue; conv via lax, BN/ReLU via jnp)
def up_conv_reference(x_nchw, conv_w, conv_b, bn_gamma, bn_beta, eps=1e-5):
    x = jnp.transpose(x_nchw, (0, 2, 3, 1)).astype(jnp.float32)
    u = upsample_bilinear_x2_align_corners(x)
    w_hwio = jnp.transpose(conv_w, (2, 3, 1, 0))
    y = jax.lax.conv_general_dilated(
        u, w_hwio, window_strides=(1, 1), padding="SAME",
        dimension_numbers=("NHWC", "HWIO", "NHWC")) + conv_b[None, None, None, :]
    mean = jnp.mean(y, axis=(0, 1, 2))
    var = jnp.mean(jnp.square(y - mean), axis=(0, 1, 2))
    out = jnp.maximum((y - mean) / jnp.sqrt(var + eps) * bn_gamma + bn_beta, 0.0)
    return jnp.transpose(out, (0, 3, 1, 2))


if __name__ == "__main__":
    N, Cin, Cout, H, W = 2, 4, 8, 16, 16

    key = jax.random.PRNGKey(0)
    k_w, k_b, k_x = jax.random.split(key, 3)
    conv_w = jax.random.normal(k_w, (Cout, Cin, 3, 3), jnp.float32) * 0.1
    conv_b = jax.random.normal(k_b, (Cout,), jnp.float32) * 0.1
    bn_gamma = jnp.ones((Cout,), jnp.float32)   # PyTorch BatchNorm2d defaults
    bn_beta = jnp.zeros((Cout,), jnp.float32)
    x = jax.random.normal(k_x, (N, Cin, H, W), jnp.float32)

    fwd = jax.jit(up_conv_forward)
    out = fwd(x, conv_w, conv_b, bn_gamma, bn_beta)
    out = jax.block_until_ready(out)

    ref = jax.block_until_ready(
        up_conv_reference(x, conv_w, conv_b, bn_gamma, bn_beta))

    assert out.shape == (N, Cout, 2 * H, 2 * W), out.shape
    assert jnp.allclose(out, ref, atol=1e-4, rtol=1e-4), (
        float(jnp.max(jnp.abs(out - ref))))
    print("KERNEL_OK")
</pallas_src>

<mosaic_0001>
module attributes {stable_mosaic.version = 11 : i64} {
  func.func @conv3x3_kernel(%arg0: i32, %arg1: i32, %arg2: memref<1x32x34x4xf32, #tpu.memory_space<vmem>>, %arg3: memref<128x128xf32, #tpu.memory_space<vmem>>, %arg4: memref<1x128xf32, #tpu.memory_space<vmem>>, %arg5: memref<1x1x256x128xf32, #tpu.memory_space<vmem>>, %arg6: memref<1x1x1x128xf32, #tpu.memory_space<vmem>>, %arg7: memref<1x1x1x128xf32, #tpu.memory_space<vmem>>) attributes {dimension_semantics = [#tpu.dimension_semantics<parallel>, #tpu.dimension_semantics<parallel>], iteration_bounds = array<i64: 2, 4>, scalar_prefetch = 0 : i64, scratch_operands = 0 : i64, tpu.core_type = #tpu.core_type<tc>, window_params = [{transform_indices = @transform_0, window_bounds = array<i64: 1, 32, 34, 4>}, {pipeline_mode = #tpu.pipeline_mode<synchronous>, transform_indices = @transform_1, window_bounds = array<i64: 128, 128>}, {pipeline_mode = #tpu.pipeline_mode<synchronous>, transform_indices = @transform_2, window_bounds = array<i64: 1, 128>}, {transform_indices = @transform_3, window_bounds = array<i64: 1, 1, 256, 128>}, {transform_indices = @transform_4, window_bounds = array<i64: 1, 1, 1, 128>}, {transform_indices = @transform_5, window_bounds = array<i64: 1, 1, 1, 128>}]} {
    %c8_i32 = arith.constant 8 : i32
    %0 = arith.muli %arg1, %c8_i32 : i32
    %c1_i32 = arith.constant 1 : i32
    %1 = arith.subi %0, %c1_i32 : i32
    %c0_i32 = arith.constant 0 : i32
    %2 = arith.maxsi %1, %c0_i32 : i32
    %c0 = arith.constant 0 : index
    %3 = arith.index_cast %2 : i32 to index
    %c0_0 = arith.constant 0 : index
    %c0_1 = arith.constant 0 : index
    %4 = vector.load %arg2[%c0, %3, %c0_0, %c0_1] : memref<1x32x34x4xf32, #tpu.memory_space<vmem>>, vector<1x1x34x4xf32>
    %5 = vector.shape_cast %4 : vector<1x1x34x4xf32> to vector<1x34x4xf32>
    %c0_i32_2 = arith.constant 0 : i32
    %6 = arith.cmpi sgt, %arg1, %c0_i32_2 : i32
    %7 = arith.extui %6 : i1 to i32
    %8 = arith.sitofp %7 : i32 to f32
    %9 = vector.broadcast %8 : f32 to vector<1x34x4xf32>
    %10 = arith.mulf %5, %9 : vector<1x34x4xf32>
    %c0_3 = arith.constant 0 : index
    %11 = arith.index_cast %0 : i32 to index
    %c0_4 = arith.constant 0 : index
    %c0_5 = arith.constant 0 : index
    %12 = vector.load %arg2[%c0_3, %11, %c0_4, %c0_5] : memref<1x32x34x4xf32, #tpu.memory_space<vmem>>, vector<1x8x34x4xf32>
    %13 = vector.shape_cast %12 : vector<1x8x34x4xf32> to vector<8x34x4xf32>
    %c8_i32_6 = arith.constant 8 : i32
    %14 = arith.addi %0, %c8_i32_6 : i32
    %c31_i32 = arith.constant 31 : i32
    %15 = arith.minsi %14, %c31_i32 : i32
    %c0_7 = arith.constant 0 : index
    %16 = arith.index_cast %15 : i32 to index
    %c0_8 = arith.constant 0 : index
    %c0_9 = arith.constant 0 : index
    %17 = vector.load %arg2[%c0_7, %16, %c0_8, %c0_9] : memref<1x32x34x4xf32, #tpu.memory_space<vmem>>, vector<1x1x34x4xf32>
    %18 = vector.shape_cast %17 : vector<1x1x34x4xf32> to vector<1x34x4xf32>
    %c3_i32 = arith.constant 3 : i32
    %19 = arith.cmpi slt, %arg1, %c3_i32 : i32
    %20 = arith.extui %19 : i1 to i32
    %21 = arith.sitofp %20 : i32 to f32
    %22 = vector.broadcast %21 : f32 to vector<1x34x4xf32>
    %23 = arith.mulf %18, %22 : vector<1x34x4xf32>
    %24 = tpu.concatenate %10, %13, %23 in 0 : vector<1x34x4xf32>, vector<8x34x4xf32>, vector<1x34x4xf32> -> vector<10x34x4xf32>
    %25 = vector.extract_strided_slice %24 {offsets = [0, 0, 0], sizes = [8, 32, 4], strides = [1, 1, 1]} : vector<10x34x4xf32> to vector<8x32x4xf32>
    %26 = vector.extract_strided_slice %24 {offsets = [0, 1, 0], sizes = [8, 32, 4], strides = [1, 1, 1]} : vector<10x34x4xf32> to vector<8x32x4xf32>
    %27 = vector.extract_strided_slice %24 {offsets = [0, 2, 0], sizes = [8, 32, 4], strides = [1, 1, 1]} : vector<10x34x4xf32> to vector<8x32x4xf32>
    %28 = vector.extract_strided_slice %24 {offsets = [1, 0, 0], sizes = [8, 32, 4], strides = [1, 1, 1]} : vector<10x34x4xf32> to vector<8x32x4xf32>
    %29 = vector.extract_strided_slice %24 {offsets = [1, 1, 0], sizes = [8, 32, 4], strides = [1, 1, 1]} : vector<10x34x4xf32> to vector<8x32x4xf32>
    %30 = vector.extract_strided_slice %24 {offsets = [1, 2, 0], sizes = [8, 32, 4], strides = [1, 1, 1]} : vector<10x34x4xf32> to vector<8x32x4xf32>
    %31 = vector.extract_strided_slice %24 {offsets = [2, 0, 0], sizes = [8, 32, 4], strides = [1, 1, 1]} : vector<10x34x4xf32> to vector<8x32x4xf32>
    %32 = vector.extract_strided_slice %24 {offsets = [2, 1, 0], sizes = [8, 32, 4], strides = [1, 1, 1]} : vector<10x34x4xf32> to vector<8x32x4xf32>
    %33 = vector.extract_strided_slice %24 {offsets = [2, 2, 0], sizes = [8, 32, 4], strides = [1, 1, 1]} : vector<10x34x4xf32> to vector<8x32x4xf32>
    %cst = arith.constant 0.000000e+00 : f32
    %34 = vector.broadcast %cst : f32 to vector<8x32x92xf32>
    %35 = tpu.concatenate %25, %26, %27, %28, %29, %30, %31, %32, %33, %34 in 2 : vector<8x32x4xf32>, vector<8x32x4xf32>, vector<8x32x4xf32>, vector<8x32x4xf32>, vector<8x32x4xf32>, vector<8x32x4xf32>, vector<8x32x4xf32>, vector<8x32x4xf32>, vector<8x32x4xf32>, vector<8x32x92xf32> -> vector<8x32x128xf32>
    %36 = vector.shape_cast %35 : vector<8x32x128xf32> to vector<256x128xf32>
    %c0_10 = arith.constant 0 : index
    %c0_11 = arith.constant 0 : index
    %37 = vector.load %arg3[%c0_10, %c0_11] : memref<128x128xf32, #tpu.memory_space<vmem>>, vector<128x128xf32>
    %cst_12 = arith.constant dense<0.000000e+00> : vector<256x128xf32>
    %38 = tpu.matmul %36, %37, %cst_12 {dimension_numbers = #tpu.dot_dimension_numbers<[1], [0], [0], [1], [0, 0, 1, 1], [], []>} : vector<256x128xf32>, vector<128x128xf32>, vector<256x128xf32> -> vector<256x128xf32>
    %c0_13 = arith.constant 0 : index
    %c0_14 = arith.constant 0 : index
    %39 = vector.load %arg4[%c0_13, %c0_14] : memref<1x128xf32, #tpu.memory_space<vmem>>, vector<1x128xf32>
    %40 = vector.broadcast %39 : vector<1x128xf32> to vector<256x128xf32>
    %41 = arith.addf %38, %40 : vector<256x128xf32>
    %c0_15 = arith.constant 0 : index
    %c0_16 = arith.constant 0 : index
    %c0_17 = arith.constant 0 : index
    %c0_18 = arith.constant 0 : index
    %42 = vector.load %arg5[%c0_15, %c0_16, %c0_17, %c0_18] : memref<1x1x256x128xf32, #tpu.memory_space<vmem>>, vector<1x1x256x128xf32>
    %43 = vector.shape_cast %42 : vector<1x1x256x128xf32> to vector<256x128xf32>
    %44 = vector.shape_cast %41 : vector<256x128xf32> to vector<1x1x256x128xf32>
    tpu.vector_store %arg5[%c0_15, %c0_16, %c0_17, %c0_18], %44 {strides = array<i32>} : memref<1x1x256x128xf32, #tpu.memory_space<vmem>>, vector<1x1x256x128xf32>,
    %cst_19 = arith.constant dense<0.000000e+00> : vector<128xf32>
    %45 = vector.multi_reduction <add>, %41, %cst_19 [0] : vector<256x128xf32> to vector<128xf32>
    %46 = vector.shape_cast %45 : vector<128xf32> to vector<1x128xf32>
    %c0_20 = arith.constant 0 : index
    %c0_21 = arith.constant 0 : index
    %c0_22 = arith.constant 0 : index
    %c0_23 = arith.constant 0 : index
    %47 = vector.load %arg6[%c0_20, %c0_21, %c0_22, %c0_23] : memref<1x1x1x128xf32, #tpu.memory_space<vmem>>, vector<1x1x1x128xf32>
    %48 = vector.shape_cast %47 : vector<1x1x1x128xf32> to vector<1x128xf32>
    %49 = vector.shape_cast %46 : vector<1x128xf32> to vector<1x1x1x128xf32>
    tpu.vector_store %arg6[%c0_20, %c0_21, %c0_22, %c0_23], %49 {strides = array<i32>} : memref<1x1x1x128xf32, #tpu.memory_space<vmem>>, vector<1x1x1x128xf32>,
    %50 = arith.mulf %41, %41 : vector<256x128xf32>
    %cst_24 = arith.constant dense<0.000000e+00> : vector<128xf32>
    %51 = vector.multi_reduction <add>, %50, %cst_24 [0] : vector<256x128xf32> to vector<128xf32>
    %52 = vector.shape_cast %51 : vector<128xf32> to vector<1x128xf32>
    %c0_25 = arith.constant 0 : index
    %c0_26 = arith.constant 0 : index
    %c0_27 = arith.constant 0 : index
    %c0_28 = arith.constant 0 : index
    %53 = vector.load %arg7[%c0_25, %c0_26, %c0_27, %c0_28] : memref<1x1x1x128xf32, #tpu.memory_space<vmem>>, vector<1x1x1x128xf32>
    %54 = vector.shape_cast %53 : vector<1x1x1x128xf32> to vector<1x128xf32>
    %55 = vector.shape_cast %52 : vector<1x128xf32> to vector<1x1x1x128xf32>
    tpu.vector_store %arg7[%c0_25, %c0_26, %c0_27, %c0_28], %55 {strides = array<i32>} : memref<1x1x1x128xf32, #tpu.memory_space<vmem>>, vector<1x1x1x128xf32>,
    return
  }
  func.func @transform_0(%arg0: i32, %arg1: i32) -> (i32, i32, i32, i32) {
    %c0_i32 = arith.constant 0 : i32
    %c0_i32_0 = arith.constant 0 : i32
    %c0_i32_1 = arith.constant 0 : i32
    %c0_i32_2 = arith.constant 0 : i32
    return %arg0, %c0_i32, %c0_i32_0, %c0_i32_1 : i32, i32, i32, i32
  }
  func.func @transform_1(%arg0: i32, %arg1: i32) -> (i32, i32) {
    %c0_i32 = arith.constant 0 : i32
    %c0_i32_0 = arith.constant 0 : i32
    %c0_i32_1 = arith.constant 0 : i32
    return %c0_i32, %c0_i32_0 : i32, i32
  }
  func.func @transform_2(%arg0: i32, %arg1: i32) -> (i32, i32) {
    %c0_i32 = arith.constant 0 : i32
    %c0_i32_0 = arith.constant 0 : i32
    %c0_i32_1 = arith.constant 0 : i32
    return %c0_i32, %c0_i32_0 : i32, i32
  }
  func.func @transform_3(%arg0: i32, %arg1: i32) -> (i32, i32, i32, i32) {
    %c0_i32 = arith.constant 0 : i32
    %c0_i32_0 = arith.constant 0 : i32
    %c0_i32_1 = arith.constant 0 : i32
    return %arg0, %arg1, %c0_i32, %c0_i32_0 : i32, i32, i32, i32
  }
  func.func @transform_4(%arg0: i32, %arg1: i32) -> (i32, i32, i32, i32) {
    %c0_i32 = arith.constant 0 : i32
    %c0_i32_0 = arith.constant 0 : i32
    %c0_i32_1 = arith.constant 0 : i32
    return %arg0, %arg1, %c0_i32, %c0_i32_0 : i32, i32, i32, i32
  }
  func.func @transform_5(%arg0: i32, %arg1: i32) -> (i32, i32, i32, i32) {
    %c0_i32 = arith.constant 0 : i32
    %c0_i32_0 = arith.constant 0 : i32
    %c0_i32_1 = arith.constant 0 : i32
    return %arg0, %arg1, %c0_i32, %c0_i32_0 : i32, i32, i32, i32
  }
}

module attributes {stable_mosaic.version = 11 : i64} {
  func.func @bn_relu_kernel(%arg0: i32, %arg1: i32, %arg2: memref<1x1x256x128xf32, #tpu.memory_space<vmem>>, %arg3: memref<1x128xf32, #tpu.memory_space<vmem>>, %arg4: memref<1x128xf32, #tpu.memory_space<vmem>>, %arg5: memref<1x1x256x128xf32, #tpu.memory_space<vmem>>) attributes {dimension_semantics = [#tpu.dimension_semantics<parallel>, #tpu.dimension_semantics<parallel>], iteration_bounds = array<i64: 2, 4>, scalar_prefetch = 0 : i64, scratch_operands = 0 : i64, tpu.core_type = #tpu.core_type<tc>, window_params = [{transform_indices = @transform_0, window_bounds = array<i64: 1, 1, 256, 128>}, {pipeline_mode = #tpu.pipeline_mode<synchronous>, transform_indices = @transform_1, window_bounds = array<i64: 1, 128>}, {pipeline_mode = #tpu.pipeline_mode<synchronous>, transform_indices = @transform_2, window_bounds = array<i64: 1, 128>}, {transform_indices = @transform_3, window_bounds = array<i64: 1, 1, 256, 128>}]} {
    %c0 = arith.constant 0 : index
    %c0_0 = arith.constant 0 : index
    %c0_1 = arith.constant 0 : index
    %c0_2 = arith.constant 0 : index
    %0 = vector.load %arg2[%c0, %c0_0, %c0_1, %c0_2] : memref<1x1x256x128xf32, #tpu.memory_space<vmem>>, vector<1x1x256x128xf32>
    %1 = vector.shape_cast %0 : vector<1x1x256x128xf32> to vector<256x128xf32>
    %c0_3 = arith.constant 0 : index
    %c0_4 = arith.constant 0 : index
    %2 = vector.load %arg3[%c0_3, %c0_4] : memref<1x128xf32, #tpu.memory_space<vmem>>, vector<1x128xf32>
    %3 = vector.broadcast %2 : vector<1x128xf32> to vector<256x128xf32>
    %4 = arith.mulf %1, %3 : vector<256x128xf32>
    %c0_5 = arith.constant 0 : index
    %c0_6 = arith.constant 0 : index
    %5 = vector.load %arg4[%c0_5, %c0_6] : memref<1x128xf32, #tpu.memory_space<vmem>>, vector<1x128xf32>
    %6 = vector.broadcast %5 : vector<1x128xf32> to vector<256x128xf32>
    %7 = arith.addf %4, %6 : vector<256x128xf32>
    %cst = arith.constant 0.000000e+00 : f32
    %8 = vector.broadcast %cst : f32 to vector<256x128xf32>
    %9 = arith.maximumf %7, %8 : vector<256x128xf32>
    %c0_7 = arith.constant 0 : index
    %c0_8 = arith.constant 0 : index
    %c0_9 = arith.constant 0 : index
    %c0_10 = arith.constant 0 : index
    %10 = vector.load %arg5[%c0_7, %c0_8, %c0_9, %c0_10] : memref<1x1x256x128xf32, #tpu.memory_space<vmem>>, vector<1x1x256x128xf32>
    %11 = vector.shape_cast %10 : vector<1x1x256x128xf32> to vector<256x128xf32>
    %12 = vector.shape_cast %9 : vector<256x128xf32> to vector<1x1x256x128xf32>
    tpu.vector_store %arg5[%c0_7, %c0_8, %c0_9, %c0_10], %12 {strides = array<i32>} : memref<1x1x256x128xf32, #tpu.memory_space<vmem>>, vector<1x1x256x128xf32>,
    return
  }
  func.func @transform_0(%arg0: i32, %arg1: i32) -> (i32, i32, i32, i32) {
    %c0_i32 = arith.constant 0 : i32
    %c0_i32_0 = arith.constant 0 : i32
    %c0_i32_1 = arith.constant 0 : i32
    return %arg0, %arg1, %c0_i32, %c0_i32_0 : i32, i32, i32, i32
  }
  func.func @transform_1(%arg0: i32, %arg1: i32) -> (i32, i32) {
    %c0_i32 = arith.constant 0 : i32
    %c0_i32_0 = arith.constant 0 : i32
    %c0_i32_1 = arith.constant 0 : i32
    return %c0_i32, %c0_i32_0 : i32, i32
  }
  func.func @transform_2(%arg0: i32, %arg1: i32) -> (i32, i32) {
    %c0_i32 = arith.constant 0 : i32
    %c0_i32_0 = arith.constant 0 : i32
    %c0_i32_1 = arith.constant 0 : i32
    return %c0_i32, %c0_i32_0 : i32, i32
  }
  func.func @transform_3(%arg0: i32, %arg1: i32) -> (i32, i32, i32, i32) {
    %c0_i32 = arith.constant 0 : i32
    %c0_i32_0 = arith.constant 0 : i32
    %c0_i32_1 = arith.constant 0 : i32
    return %arg0, %arg1, %c0_i32, %c0_i32_0 : i32, i32, i32, i32
  }
}

</mosaic_0001>

<bundles_post_ra>
// kernel: up_conv_forward.2
= control target key start
LH: loop header
LB: loop body
LE: loop exit
PB: predicated region body
PF: predicated region fallthrough
CT: control target
= control target key end

     0   :  { %s2573_s18 = smov 0   ;;  %s2575_s19 = smov 0   ;;  %s4297_s0 = inlined_call_operand.vmem [shape: f32[2,32,34,4], index: 0, kind: input, shape index: {}]   ;;  %s4298_s1 = inlined_call_operand.vmem [shape: f32[128,128], index: 1, kind: input, shape index: {}]   ;;  %s4299_s2 = inlined_call_operand.vmem [shape: f32[1,128], index: 2, kind: input, shape index: {}]   ;;  %s4300_s3 = inlined_call_operand.vmem [shape: f32[2,4,256,128], index: 3, kind: output, shape index: {0}]   ;;  %s4301_s4 = inlined_call_operand.vmem [shape: f32[2,4,1,128], index: 4, kind: output, shape index: {1}]   ;;  %s4302_s5 = inlined_call_operand.vmem [shape: f32[2,4,1,128], index: 5, kind: output, shape index: {2}]  }
   0x1   :  { %s2577_s20 = smov 0   ;;  %s2579_s21 = smov 0  }
   0x2   :  { %s2581_s22 = smov 0  }
   0x3 LB: > { %s25_s23 = sadd.s32 1, %s2525_s20  ;;  %s28_s24 = sadd.s32 1, %s2529_s21  ;;  %s2533_s22 = sphi %s2581_s22, %s16_s22   ;;  %s2529_s21 = sphi %s2579_s21, %s4532_s21   ;;  %s2525_s20 = sphi %s2577_s20, %s4531_s20   ;;  %s2521_s19 = sphi %s2575_s19, %s4530_s19   ;;  %s2517_s18 = sphi %s2573_s18, %s4529_s18  }
   0x4   : > { %p26_p0 = scmp.ge.s32.totalorder %s25_s23, 4  ;;  %p2228_p1 = scmp.ge.s32.totalorder %s2533_s22, 1 }
   0x5   : > { %p210_p2 = scmp.lt.s32.totalorder %s2533_s22, 9 }
   0x6   : > { %s4534_s23 = smov (%p26_p0, %s25_s23), 0  ;;  %s4536_s24 = smov (!%p26_p0, %s28_s24), %s2529_s21 }
   0x7   : > { %p211_p3 = pnand %p2228_p1, %p210_p2  ;;  %p30_p4 = scmp.ge.s32.totalorder %s4536_s24, 2 }
   0x9   : > { %s4538_s24 = smov (%p30_p4, %s4536_s24), 0  ;;  %214 = sbr.rel (%p211_p3) target bundleno = 866 (0x362), region = 32 }
   0xe   : > { %p256_p5 = scmp.lt.s32.totalorder %s2521_s19, 1  ;;  %s2237_s25 = smul.u32 320, %s2517_s18  ;;  %vm405_vm0 = vcmask 1046528   ;;  %vm574_vm1 = vcmask 1045504   ;;  %vm1365_vm2 = vcmask 31744   ;;  %vm1398_vm3 = vcmask 64512  }
   0xf   : > { %s2235_s26 = sshll.u32 %s2517_s18, 3  ;;  %p295_p6 = scmp.gt.s32.totalorder %s2517_s18, 0  ;;  %vm1431_vm4 = vcmask 97280   ;;  %vm1464_vm5 = vcmask 130048   ;;  %vm1497_vm6 = vcmask 162816   ;;  %vm1530_vm7 = vcmask 195584  }
  0x10   : > { %s4540_s19 = smov (!%p256_p5, %s2521_s19), 1  ;;  %s2236_s27 = sadd.s32 4294967295, %s2235_s26  ;;  %vm1563_vm8 = vcmask 228352   ;;  %vm1596_vm9 = vcmask 261120   ;;  %vm1629_vm10 = vcmask 293888  }
  0x11   : > { %s2433_s28 = smul.u32 1280, %s4540_s19  ;;  %p286_p7 = scmp.gt.s32.totalorder %s2236_s27, 0 }
  0x12   : > { %s296_s29 = scalar_select %p295_p6, 1, 0 }
  0x13   : > { %s2616_s7 = scalar_lea.vmem %s4297_s0, %s2433_s28  ;;  %s4542_s27 = smov (!%p286_p7, %s2236_s27), 0 }
  0x14   : > { %s2619_s8 = scalar_lea.vmem %s2616_s7, %s2237_s25  ;;  %s297_s9 = scvt.s32.f32 %s296_s29 }
  0x15   : > { %v2622_v0 = vld [vmem:[%s2619_s8 + $0x8] sm:$0xff]  ;;  %v2625_v1 = vld [vmem:[%s2619_s8 + $0x10] sm:$0xff]  ;;  %v2628_v2 = vld [vmem:[%s2619_s8] sm:$0xff]  ;;  %s288_s10 = smul.u32 40, %s4542_s27  ;;  %s2535_s11 = smov 4  }
  0x16   : > { %v416_v3 = vrot.slane %v2622_v0, 1  ;;  %v418_v4 = vrot.slane %v2625_v1, 1  ;;  %v415_v5 = vrot.slane %v2628_v2, 1  ;;  %v2634_v6 = vld [vmem:[%s2619_s8 + $0x18] sm:$0xff]  ;;  %v2637_v7 = vld [vmem:[%s2619_s8 + $0x20] sm:$0x3]  ;;  %v298_v12 = vstv %s297_s9 }
  0x17   : > { %v420_v8 = vrot.slane %v2634_v6, 1  ;;  %v422_v9 = vrot.slane %v2637_v7, 1  ;;  %s289_s12 = scalar_lea.vmem %s2616_s7, %s288_s10  ;;  %v2678_v30 = vld [vmem:[%s2619_s8 + $0x30] sm:$0xff]  ;;  %v2682_v32 = vld [vmem:[%s2619_s8 + $0x38] sm:$0xff]  ;;  %v2685_v33 = vld [vmem:[%s2619_s8 + $0x28] sm:$0xff]  ;;  %s2536_s13 = smov 8  }
  0x18   : > { %v2642_v10 = vsel %vm405_vm0, %v416_v3, %v418_v4  ;;  %v2645_v11 = vsel %vm405_vm0, %v415_v5, %v416_v3  ;;  %v292_v15 = vld [vmem:[%s289_s12 + $0x10] sm:$0xff]  ;;  %v293_v16 = vld [vmem:[%s289_s12 + $0x18] sm:$0xff]  ;;  %v290_v17 = vld [vmem:[%s289_s12] sm:$0xff]  ;;  %v425_v35 = vrot.slane %v2678_v30, 1  ;;  %v427_v38 = vrot.slane %v2682_v32, 1  ;;  %s2537_s14 = smov 12  }
  0x19   : > { %488 = vrot.lane.b32.xlu1 %v2642_v10, %s2535_s11  ;;  %486 = vrot.lane.b32.xlu0 %v2645_v11, %s2535_s11  ;;  %v2653_v13 = vsel %vm405_vm0, %v420_v8, %v422_v9  ;;  %v2656_v14 = vsel %vm405_vm0, %v418_v4, %v420_v8  ;;  %v2658_v18 = vmul.f32 %v298_v12, %v292_v15  ;;  %v291_v20 = vld [vmem:[%s289_s12 + $0x8] sm:$0xff]  ;;  %v294_v22 = vld [vmem:[%s289_s12 + $0x20] sm:$0x3]  ;;  %v424_v39 = vrot.slane %v2685_v33, 1  ;;  %s2538_s27 = smov 16   ;;  %s2539_s30 = smov 20  }
  0x1a   : > { %v2660_v19 = vmul.f32 %v298_v12, %v293_v16  ;;  %v2662_v21 = vmul.f32 %v298_v12, %v290_v17  ;;  %v2664_v23 = vmul.f32 %v298_v12, %v291_v20  ;;  %v2666_v24 = vmul.f32 %v298_v12, %v294_v22  ;;  %v2696_v40 = vld [vmem:[%s2619_s8 + $0x40] sm:$0xff]  ;;  %v2699_v41 = vld [vmem:[%s2619_s8 + $0x48] sm:$0x3]  ;;  %v2712_v46 = vld [vmem:[%s2619_s8 + $0x58] sm:$0xff]  ;;  %s2540_s12 = smov 24   ;;  %s2541_s16 = smov 28  }
  0x1b   : > { %4387 = vst [vmem:[#allocation2_spill] sm:$0xff] %v2658_v18  ;;  %v409_v25 = vrot.slane %v2658_v18, 1  ;;  %v2704_v42 = vsel %vm405_vm0, %v425_v35, %v427_v38  ;;  %v2707_v43 = vsel %vm405_vm0, %v424_v39, %v425_v35  ;;  %v429_v44 = vrot.slane %v2696_v40, 1  ;;  %v2715_v47 = vld [vmem:[%s2619_s8 + $0x60] sm:$0xff]  ;;  %v2718_v48 = vld [vmem:[%s2619_s8 + $0x50] sm:$0xff]  ;;  %v2734_v54 = vld [vmem:[%s2619_s8 + $0x68] sm:$0xff] }
  0x1c   : > { %4388 = vst [vmem:[#allocation3_spill] sm:$0xff] %v2660_v19  ;;  %4389 = vst [vmem:[#allocation4_spill] sm:$0xff] %v2662_v21  ;;  %v411_v26 = vrot.slane %v2660_v19, 1  ;;  %v406_v27 = vrot.slane %v2662_v21, 1  ;;  %v407_v28 = vrot.slane %v2664_v23, 1  ;;  %v413_v29 = vrot.slane %v2666_v24, 1 }
  0x1d   : > { %4390 = vst [vmem:[#allocation5_spill] sm:$0xff] %v2664_v23  ;;  %492 = vrot.lane.b32.xlu1 %v2653_v13, %s2535_s11  ;;  %490 = vrot.lane.b32.xlu0 %v2656_v14, %s2535_s11  ;;  %v431_v45 = vrot.slane %v2699_v41, 1  ;;  %v434_v49 = vrot.slane %v2712_v46, 1  ;;  %v2729_v51 = vsel %vm405_vm0, %v427_v38, %v429_v44  ;;  %v436_v52 = vrot.slane %v2715_v47, 1  ;;  %v2737_v55 = vld [vmem:[%s2619_s8 + $0x70] sm:$0x3] }
  0x1e   : > { %v412_v31 = vsel %vm405_vm0, %v409_v25, %v411_v26  ;;  %v408_v34 = vsel %vm405_vm0, %v406_v27, %v407_v28  ;;  %v414_v36 = vsel %vm405_vm0, %v411_v26, %v413_v29  ;;  %v410_v37 = vsel %vm405_vm0, %v407_v28, %v409_v25  ;;  %v2752_v60 = vld [vmem:[%s2619_s8 + $0x80] sm:$0xff]  ;;  %v2755_v61 = vld [vmem:[%s2619_s8 + $0x88] sm:$0xff]  ;;  %v2758_v62 = vld [vmem:[%s2619_s8 + $0x78] sm:$0xff]  ;;  %s2542_s10 = smov 32   ;;  %p263_p9 = scmp.lt.s32.totalorder %s2517_s18, 3 }
  0x1f   : > { %v2726_v50 = vsel %vm405_vm0, %v429_v44, %v431_v45  ;;  %v433_v53 = vrot.slane %v2718_v48, 1  ;;  %v2744_v56 = vsel %vm405_vm0, %v434_v49, %v436_v52  ;;  %v438_v58 = vrot.slane %v2734_v54, 1  ;;  %v2774_v9 = vld [vmem:[%s2619_s8 + $0x90] sm:$0xff]  ;;  %v2777_v12 = vld [vmem:[%s2619_s8 + $0x98] sm:$0x3]  ;;  %v2792_v22 = vld [vmem:[%s2619_s8 + $0xa8] sm:$0xff] }
  0x20   : > { %v440_v59 = vrot.slane %v2737_v55, 1  ;;  %v443_v63 = vrot.slane %v2752_v60, 1  ;;  %v445_v5 = vrot.slane %v2755_v61, 1  ;;  %v442_v8 = vrot.slane %v2758_v62, 1  ;;  %v2795_v25 = vld [vmem:[%s2619_s8 + $0xb0] sm:$0xff]  ;;  %v2798_v26 = vld [vmem:[%s2619_s8 + $0xa0] sm:$0xff] }
  0x21   : > { %482 = vrot.lane.b32.xlu1 %v412_v31, %s2535_s11  ;;  %478 = vrot.lane.b32.xlu0 %v408_v34, %s2535_s11  ;;  %v2747_v57 = vsel %vm405_vm0, %v433_v53, %v434_v49  ;;  %v2769_v4 = vsel %vm405_vm0, %v436_v52, %v438_v58  ;;  %v447_v17 = vrot.slane %v2774_v9, 1  ;;  %v449_v20 = vrot.slane %v2777_v12, 1  ;;  %v2814_v35 = vld [vmem:[%s2619_s8 + $0xb8] sm:$0xff]  ;;  %v2832_v45 = vld [vmem:[%s2619_s8 + $0xd0] sm:$0xff]  ;;  %s4546_s18 = smov (!%p263_p9, %s2517_s18), 3 }
  0x22   : > { %v2766_v3 = vsel %vm405_vm0, %v438_v58, %v440_v59  ;;  %4392 = vst [vmem:[#allocation7_spill] sm:$0xff] %v2769_v4  ;;  %v2784_v15 = vsel %vm405_vm0, %v443_v63, %v445_v5  ;;  %v2787_v16 = vsel %vm405_vm0, %v442_v8, %v443_v63  ;;  %v452_v27 = vrot.slane %v2792_v22, 1  ;;  %v2835_v49 = vld [vmem:[%s2619_s8 + $0xd8] sm:$0xff]  ;;  %v2838_v52 = vld [vmem:[%s2619_s8 + $0xc8] sm:$0xff]  ;;  %v2854_v8 = vld [vmem:[%s2619_s8 + $0xe0] sm:$0xff] }
  0x23   : > { %4391 = vst [vmem:[#allocation6_spill] sm:$0xff] %v2766_v3  ;;  %4393 = vst [vmem:[#allocation8_spill] sm:$0xff] %v2784_v15  ;;  %v2806_v28 = vsel %vm405_vm0, %v447_v17, %v449_v20  ;;  %v2809_v29 = vsel %vm405_vm0, %v445_v5, %v447_v17  ;;  %v454_v31 = vrot.slane %v2795_v25, 1  ;;  %v451_v34 = vrot.slane %v2798_v26, 1  ;;  %v2857_v17 = vld [vmem:[%s2619_s8 + $0xe8] sm:$0x3] }
  0x24   : > { %4394 = vst [vmem:[#allocation9_spill] sm:$0xff] %v2787_v16  ;;  %4395 = vst [vmem:[#allocation10_spill] sm:$0xff] %v2806_v28  ;;  %v456_v39 = vrot.slane %v2814_v35, 1  ;;  %v461_v53 = vrot.slane %v2832_v45, 1  ;;  %v463_v63 = vrot.slane %v2835_v49, 1  ;;  %v460_v5 = vrot.slane %v2838_v52, 1 }
  0x25   : > { %484 = vrot.lane.b32.xlu1 %v414_v36, %s2535_s11  ;;  %480 = vrot.lane.b32.xlu0 %v410_v37, %s2535_s11  ;;  %4396 = vst [vmem:[#allocation11_spill] sm:$0xff] %v2809_v29  ;;  %v2817_v36 = vld [vmem:[%s2619_s8 + $0xc0] sm:$0x3]  ;;  %v2824_v37 = vsel %vm405_vm0, %v452_v27, %v454_v31  ;;  %v2827_v38 = vsel %vm405_vm0, %v451_v34, %v452_v27  ;;  %v467_v34 = vrot.slane %v2857_v17, 1 }
  0x26   : > { %4397 = vst [vmem:[#allocation12_spill] sm:$0xff] %v2824_v37  ;;  %4398 = vst [vmem:[#allocation13_spill] sm:$0xff] %v2827_v38  ;;  %v458_v44 = vrot.slane %v2817_v36, 1  ;;  %v2849_v59 = vsel %vm405_vm0, %v454_v31, %v456_v39  ;;  %v2864_v20 = vsel %vm405_vm0, %v461_v53, %v463_v63  ;;  %v2867_v27 = vsel %vm405_vm0, %v460_v5, %v461_v53 }
  0x27   : > { %4400 = vst [vmem:[#allocation15_spill] sm:$0xff] %v2849_v59  ;;  %4401 = vst [vmem:[#allocation16_spill] sm:$0xff] %v2864_v20  ;;  %v465_v31 = vrot.slane %v2854_v8, 1 }
  0x28   : > { %v2846_v58 = vsel %vm405_vm0, %v456_v39, %v458_v44  ;;  %4402 = vst [vmem:[#allocation17_spill] sm:$0xff] %v2867_v27  ;;  %v2872_v39 = vld [vmem:[%s2619_s8 + $0xf8] sm:$0xff]  ;;  %v2875_v44 = vld [vmem:[%s2619_s8 + $0x100] sm:$0xff] }
  0x29   : > { %496 = vrot.lane.b32.xlu1 %v2704_v42, %s2535_s11  ;;  %494 = vrot.lane.b32.xlu0 %v2707_v43, %s2535_s11  ;;  %4399 = vst [vmem:[#allocation14_spill] sm:$0xff] %v2846_v58  ;;  %4403 = vst [vmem:[#allocation18_spill] sm:$0xff] %v2872_v39  ;;  %v2886_v53 = vsel %vm405_vm0, %v465_v31, %v467_v34  ;;  %v2889_v5 = vsel %vm405_vm0, %v463_v63, %v465_v31 }
  0x2a   : > { %4404 = vst [vmem:[#allocation19_spill] sm:$0xff] %v2875_v44  ;;  %4406 = vst [vmem:[#allocation21_spill] sm:$0xff] %v2886_v53 }
  0x2b   : > { %4407 = vst [vmem:[#allocation22_spill] sm:$0xff] %v2889_v5 }
  0x2d   : > { %500 = vrot.lane.b32.xlu1 %v2726_v50, %s2535_s11  ;;  %498 = vrot.lane.b32.xlu0 %v2729_v51, %s2535_s11 }
  0x31   : > { %504 = vrot.lane.b32.xlu1 %v2744_v56, %s2535_s11  ;;  %502 = vrot.lane.b32.xlu0 %v2747_v57, %s2535_s11 }
  0x35   : > { %508 = vrot.lane.b32.xlu1 %v2766_v3, %s2535_s11  ;;  %506 = vrot.lane.b32.xlu0 %v2769_v4, %s2535_s11  ;;  %v1675_v3 = vld [vmem:[%s4298_s1 + $0x68] sm:$0xff] }
  0x39   : > { %512 = vrot.lane.b32.xlu1 %v2784_v15, %s2535_s11  ;;  %510 = vrot.lane.b32.xlu0 %v2787_v16, %s2535_s11  ;;  %v578_v15 = vrot.slane %v2658_v18, 2  ;;  %v584_v18 = vrot.slane %v2628_v2, 2 }
  0x3d   : > { %516 = vrot.lane.b32.xlu1 %v2806_v28, %s2535_s11  ;;  %514 = vrot.lane.b32.xlu0 %v2809_v29, %s2535_s11  ;;  %v2894_v28 = vld [vmem:[%s2619_s8 + $0x108] sm:$0xff]  ;;  %v2897_v29 = vld [vmem:[%s2619_s8 + $0x110] sm:$0x3] }
  0x3e   : > { %4408 = vst [vmem:[#allocation23_spill] sm:$0xff] %v2894_v28  ;;  %v474_v34 = vrot.slane %v2894_v28, 1  ;;  %v476_v31 = vrot.slane %v2897_v29, 1 }
  0x41   : > { %520 = vrot.lane.b32.xlu1 %v2824_v37, %s2535_s11  ;;  %518 = vrot.lane.b32.xlu0 %v2827_v38, %s2535_s11  ;;  %v472_v37 = vrot.slane %v2875_v44, 1 }
  0x45   : > { %524 = vrot.lane.b32.xlu1 %v2846_v58, %s2535_s11  ;;  %522 = vrot.lane.b32.xlu0 %v2849_v59, %s2535_s11  ;;  %v2878_v58 = vld [vmem:[%s2619_s8 + $0xf0] sm:$0xff]  ;;  %v470_v59 = vrot.slane %v2872_v39, 1 }
  0x46   : > { %4405 = vst [vmem:[#allocation20_spill] sm:$0xff] %v2878_v58  ;;  %v469_v38 = vrot.slane %v2878_v58, 1 }
  0x48   : > { %v2908_v63 = vsel %vm405_vm0, %v469_v38, %v470_v59  ;;  %v575_v38 = vrot.slane %v2662_v21, 2 }
  0x49   : > { %528 = vrot.lane.b32.xlu1 %v2864_v20, %s2535_s11  ;;  %526 = vrot.lane.b32.xlu0 %v2867_v27, %s2535_s11  ;;  %v2905_v20 = vsel %vm405_vm0, %v470_v59, %v472_v37  ;;  %4410 = vst [vmem:[#allocation25_spill] sm:$0xff] %v2908_v63  ;;  %v576_v27 = vrot.slane %v2664_v23, 2 }
  0x4a   : > { %4409 = vst [vmem:[#allocation24_spill] sm:$0xff] %v2905_v20 }
  0x4b   : > { %v579_v59 = vsel %vm574_vm1, %v576_v27, %v578_v15 }
  0x4d   : > { %532 = vrot.lane.b32.xlu1 %v2886_v53, %s2535_s11  ;;  %530 = vrot.lane.b32.xlu0 %v2889_v5, %s2535_s11  ;;  %v2916_v53 = vsel %vm405_vm0, %v472_v37, %v474_v34  ;;  %v2919_v5 = vsel %vm405_vm0, %v474_v34, %v476_v31  ;;  %v577_v37 = vsel %vm574_vm1, %v575_v38, %v576_v27  ;;  %v580_v34 = vrot.slane %v2660_v19, 2 }
  0x4e   : > { %4411 = vst [vmem:[#allocation26_spill] sm:$0xff] %v2916_v53  ;;  %4412 = vst [vmem:[#allocation27_spill] sm:$0xff] %v2919_v5  ;;  %v582_v31 = vrot.slane %v2666_v24, 2  ;;  %v589_v24 = vrot.slane %v2634_v6, 2 }
  0x51   : > { %536 = vrot.lane.b32.xlu1 %v2905_v20, %s2535_s11  ;;  %534 = vrot.lane.b32.xlu0 %v2908_v63, %s2535_s11  ;;  %v585_v20 = vrot.slane %v2622_v0, 2  ;;  %v581_v63 = vsel %vm574_vm1, %v578_v15, %v580_v34 }
  0x53   : > { %v2946_v38 = vsel %vm574_vm1, %v584_v18, %v585_v20  ;;  %v593_v18 = vrot.slane %v2685_v33, 2 }
  0x55   : > { %540 = vrot.lane.b32.xlu1 %v2919_v5, %s2535_s11  ;;  %538 = vrot.lane.b32.xlu0 %v2916_v53, %s2535_s11  ;;  %v583_v5 = vsel %vm574_vm1, %v580_v34, %v582_v31  ;;  %v587_v53 = vrot.slane %v2625_v1, 2  ;;  %v600_v34 = vrot.slane %v2699_v41, 2  ;;  %v603_v31 = vrot.slane %v2712_v46, 2  ;;  %s346_s11 = sadd.s32 8, %s2235_s26 }
  0x56   : > { %p347_p8 = scmp.lt.s32.totalorder %s346_s11, 31 }
  0x57   : > { %v2943_v27 = vsel %vm574_vm1, %v585_v20, %v587_v53  ;;  %v2954_v15 = vsel %vm574_vm1, %v587_v53, %v589_v24  ;;  %v598_v53 = vrot.slane %v2696_v40, 2  ;;  %s357_s26 = scalar_select %p263_p9, 1, 0 }
  0x58   : > { %s4544_s11 = smov (!%p347_p8, %s346_s11), 31 }
  0x59   : > { %649 = vrot.lane.b32.xlu1 %v579_v59, %s2536_s13  ;;  %647 = vrot.lane.b32.xlu0 %v577_v37, %s2536_s13  ;;  %v591_v59 = vrot.slane %v2637_v7, 2  ;;  %v596_v37 = vrot.slane %v2682_v32, 2 }
  0x5d   : > { %653 = vrot.lane.b32.xlu1 %v583_v5, %s2536_s13  ;;  %651 = vrot.lane.b32.xlu0 %v581_v63, %s2536_s13  ;;  %v2957_v5 = vsel %vm574_vm1, %v589_v24, %v591_v59  ;;  %v594_v63 = vrot.slane %v2678_v30, 2  ;;  %v2980_v24 = vsel %vm574_vm1, %v598_v53, %v600_v34  ;;  %v2983_v59 = vsel %vm574_vm1, %v596_v37, %v598_v53 }
  0x5e   : > { %v607_v34 = vrot.slane %v2734_v54, 2  ;;  %v612_v53 = vrot.slane %v2752_v60, 2 }
  0x5f   : > { %v2967_v7 = vsel %vm574_vm1, %v594_v63, %v596_v37  ;;  %v2970_v20 = vsel %vm574_vm1, %v593_v18, %v594_v63  ;;  %v605_v63 = vrot.slane %v2715_v47, 2  ;;  %v602_v18 = vrot.slane %v2718_v48, 2 }
  0x60   : > { %v609_v37 = vrot.slane %v2737_v55, 2 }
  0x61   : > { %657 = vrot.lane.b32.xlu1 %v2943_v27, %s2536_s13  ;;  %655 = vrot.lane.b32.xlu0 %v2946_v38, %s2536_s13  ;;  %v2992_v41 = vsel %vm574_vm1, %v603_v31, %v605_v63  ;;  %v2995_v19 = vsel %vm574_vm1, %v602_v18, %v603_v31  ;;  %v3008_v21 = vsel %vm574_vm1, %v605_v63, %v607_v34  ;;  %v614_v31 = vrot.slane %v2755_v61, 2 }
  0x62   : > { %4413 = vst [vmem:[#allocation28_spill] sm:$0xff] %v2992_v41  ;;  %4414 = vst [vmem:[#allocation29_spill] sm:$0xff] %v2995_v19  ;;  %v3005_v23 = vsel %vm574_vm1, %v607_v34, %v609_v37  ;;  %v611_v18 = vrot.slane %v2758_v62, 2  ;;  %v616_v37 = vrot.slane %v2774_v9, 2  ;;  %v618_v63 = vrot.slane %v2777_v12, 2 }
  0x63   : > { %4415 = vst [vmem:[#allocation30_spill] sm:$0xff] %v3005_v23  ;;  %4416 = vst [vmem:[#allocation31_spill] sm:$0xff] %v3008_v21  ;;  %v3017_v55 = vsel %vm574_vm1, %v612_v53, %v614_v31  ;;  %v621_v34 = vrot.slane %v2792_v22, 2 }
  0x64   : > { %4417 = vst [vmem:[#allocation32_spill] sm:$0xff] %v3017_v55  ;;  %v3020_v16 = vsel %vm574_vm1, %v611_v18, %v612_v53  ;;  %v623_v53 = vrot.slane %v2795_v25, 2  ;;  %v620_v18 = vrot.slane %v2798_v26, 2 }
  0x65   : > { %661 = vrot.lane.b32.xlu1 %v2957_v5, %s2536_s13  ;;  %659 = vrot.lane.b32.xlu0 %v2954_v15, %s2536_s13  ;;  %4418 = vst [vmem:[#allocation33_spill] sm:$0xff] %v3020_v16 }
  0x66   : > { %v3042_v12 = vsel %vm574_vm1, %v621_v34, %v623_v53 }
  0x67   : > { %4421 = vst [vmem:[#allocation36_spill] sm:$0xff] %v3042_v12 }
  0x69   : > { %665 = vrot.lane.b32.xlu1 %v2967_v7, %s2536_s13  ;;  %663 = vrot.lane.b32.xlu0 %v2970_v20, %s2536_s13 }
  0x6d   : > { %669 = vrot.lane.b32.xlu1 %v2980_v24, %s2536_s13  ;;  %667 = vrot.lane.b32.xlu0 %v2983_v59, %s2536_s13 }
  0x71   : > { %673 = vrot.lane.b32.xlu1 %v2992_v41, %s2536_s13  ;;  %671 = vrot.lane.b32.xlu0 %v2995_v19, %s2536_s13 }
  0x75   : > { %677 = vrot.lane.b32.xlu1 %v3005_v23, %s2536_s13  ;;  %675 = vrot.lane.b32.xlu0 %v3008_v21, %s2536_s13  ;;  %v3030_v23 = vsel %vm574_vm1, %v616_v37, %v618_v63  ;;  %v3033_v21 = vsel %vm574_vm1, %v614_v31, %v616_v37  ;;  %v625_v63 = vrot.slane %v2814_v35, 2  ;;  %v627_v31 = vrot.slane %v2817_v36, 2 }
  0x76   : > { %4419 = vst [vmem:[#allocation34_spill] sm:$0xff] %v3030_v23  ;;  %4420 = vst [vmem:[#allocation35_spill] sm:$0xff] %v3033_v21  ;;  %v630_v37 = vrot.slane %v2832_v45, 2 }
  0x79   : > { %681 = vrot.lane.b32.xlu1 %v3017_v55, %s2536_s13  ;;  %679 = vrot.lane.b32.xlu0 %v3020_v16, %s2536_s13  ;;  %v3045_v55 = vsel %vm574_vm1, %v620_v18, %v621_v34  ;;  %v632_v34 = vrot.slane %v2835_v49, 2  ;;  %v629_v18 = vrot.slane %v2838_v52, 2 }
  0x7a   : > { %4422 = vst [vmem:[#allocation37_spill] sm:$0xff] %v3045_v55 }
  0x7b   : > { %v3067_v36 = vsel %vm574_vm1, %v630_v37, %v632_v34 }
  0x7c   : > { %4425 = vst [vmem:[#allocation40_spill] sm:$0xff] %v3067_v36 }
  0x7d   : > { %685 = vrot.lane.b32.xlu1 %v3030_v23, %s2536_s13  ;;  %683 = vrot.lane.b32.xlu0 %v3033_v21, %s2536_s13  ;;  %v3055_v23 = vsel %vm574_vm1, %v625_v63, %v627_v31  ;;  %v3058_v21 = vsel %vm574_vm1, %v623_v53, %v625_v63  ;;  %v634_v31 = vrot.slane %v2854_v8, 2  ;;  %v636_v53 = vrot.slane %v2857_v17, 2 }
  0x7e   : > { %4423 = vst [vmem:[#allocation38_spill] sm:$0xff] %v3055_v23  ;;  %4424 = vst [vmem:[#allocation39_spill] sm:$0xff] %v3058_v21  ;;  %v639_v63 = vrot.slane %v2872_v39, 2 }
  0x81   : > { %689 = vrot.lane.b32.xlu1 %v3042_v12, %s2536_s13  ;;  %687 = vrot.lane.b32.xlu0 %v3045_v55, %s2536_s13  ;;  %v3070_v12 = vsel %vm574_vm1, %v629_v18, %v630_v37  ;;  %v641_v37 = vrot.slane %v2875_v44, 2  ;;  %v638_v18 = vrot.slane %v2878_v58, 2 }
  0x82   : > { %4426 = vst [vmem:[#allocation41_spill] sm:$0xff] %v3070_v12 }
  0x85   : > { %693 = vrot.lane.b32.xlu1 %v3055_v23, %s2536_s13  ;;  %691 = vrot.lane.b32.xlu0 %v3058_v21, %s2536_s13  ;;  %v3080_v23 = vsel %vm574_vm1, %v634_v31, %v636_v53  ;;  %v3083_v21 = vsel %vm574_vm1, %v632_v34, %v634_v31  ;;  %v3096_v53 = vsel %vm574_vm1, %v639_v63, %v641_v37  ;;  %v643_v31 = vrot.slane %v2894_v28, 2 }
  0x86   : > { %4427 = vst [vmem:[#allocation42_spill] sm:$0xff] %v3080_v23  ;;  %4428 = vst [vmem:[#allocation43_spill] sm:$0xff] %v3083_v21  ;;  %v3099_v34 = vsel %vm574_vm1, %v638_v18, %v639_v63 }
  0x87   : > { %4431 = vst [vmem:[#allocation46_spill] sm:$0xff] %v3096_v53  ;;  %4432 = vst [vmem:[#allocation47_spill] sm:$0xff] %v3099_v34  ;;  %v3115_v63 = vsel %vm574_vm1, %v641_v37, %v643_v31 }
  0x88   : > { %4435 = vst [vmem:[#allocation50_spill] sm:$0xff] %v3115_v63 }
  0x89   : > { %697 = vrot.lane.b32.xlu1 %v3067_v36, %s2536_s13  ;;  %695 = vrot.lane.b32.xlu0 %v3070_v12, %s2536_s13  ;;  %v645_v36 = vrot.slane %v2897_v29, 2 }
  0x8b   : > { %v3087_v55 = vpop.permute.xlu1 %488  ;;  %v3089_v17 = vpop.permute.xlu0 %486 }
  0x8c   : > { %4429 = vst [vmem:[#allocation44_spill] sm:$0xff] %v3087_v55  ;;  %4430 = vst [vmem:[#allocation45_spill] sm:$0xff] %v3089_v17 }
  0x8d   : > { %701 = vrot.lane.b32.xlu1 %v3080_v23, %s2536_s13  ;;  %699 = vrot.lane.b32.xlu0 %v3083_v21, %s2536_s13  ;;  %v3112_v23 = vsel %vm574_vm1, %v643_v31, %v645_v36 }
  0x8e   : > { %4434 = vst [vmem:[#allocation49_spill] sm:$0xff] %v3112_v23 }
  0x8f   : > { %v3103_v12 = vpop.permute.xlu1 %492  ;;  %v3105_v55 = vpop.permute.xlu0 %490 }
  0x90   : > { %4433 = vst [vmem:[#allocation48_spill] sm:$0xff] %v3105_v55 }
  0x91   : > { %705 = vrot.lane.b32.xlu1 %v3096_v53, %s2536_s13  ;;  %703 = vrot.lane.b32.xlu0 %v3099_v34, %s2536_s13 }
  0x93   : > { %v3117_v18 = vpop.permute.xlu1 %482  ;;  %v3119_v21 = vpop.permute.xlu0 %478 }
  0x94   : > { %4436 = vst [vmem:[#allocation51_spill] sm:$0xff] %v3117_v18  ;;  %4437 = vst [vmem:[#allocation52_spill] sm:$0xff] %v3119_v21  ;;  %v1677_v18 = vld [vmem:[%s4298_s1 + $0x78] sm:$0xff] }
  0x95   : > { %709 = vrot.lane.b32.xlu1 %v3112_v23, %s2536_s13  ;;  %707 = vrot.lane.b32.xlu0 %v3115_v63, %s2536_s13  ;;  %s349_s13 = smul.u32 40, %s4544_s11 }
  0x96   : > { %2321 = vmatprep.subr.mxu0 %v1677_v18  ;;  %2401 = vmatprep.subr.mxu1 %v1677_v18 }
  0x97   : > { %v3125_v29 = vpop.permute.xlu1 %484  ;;  %v3127_v53 = vpop.permute.xlu0 %480  ;;  %2322 = vmatpush3.msra.mxu0 %v1677_v18  ;;  %2417 = vmatpush3.msra.mxu1 %v1677_v18  ;;  %v1674_v18 = vld [vmem:[%s4298_s1 + $0x60] sm:$0xff]  ;;  %s3990_s15 = scalar_lea.vmem %s2616_s7, %s349_s13  ;;  %s2230_s7 = sshll.u32 %s4546_s18, 5 }
  0x98   : > { %4438 = vst [vmem:[#allocation53_spill] sm:$0xff] %v3125_v29  ;;  %4439 = vst [vmem:[#allocation54_spill] sm:$0xff] %v3127_v53  ;;  %v1676_v53 = vld [vmem:[%s4298_s1 + $0x70] sm:$0xff] }
  0x99   : > { %749 = vrot.lane.b32.xlu1 %v2622_v0, %s2537_s14  ;;  %747 = vrot.lane.b32.xlu0 %v2628_v2, %s2537_s14 }
  0x9a   : > { %2323 = vmatprep.subr.mxu0 %v1676_v53  ;;  %2402 = vmatprep.subr.mxu1 %v1676_v53 }
  0x9b   : > { %v3133_v36 = vpop.permute.xlu1 %496  ;;  %v3135_v37 = vpop.permute.xlu0 %494  ;;  %2324 = vmatpush3.msra.mxu0 %v1676_v53  ;;  %2418 = vmatpush3.msra.mxu1 %v1676_v53  ;;  %v1673_v53 = vld [vmem:[%s4298_s1 + $0x58] sm:$0xff] }
  0x9c   : > { %2325 = vmatprep.subr.mxu0 %v1675_v3  ;;  %2403 = vmatprep.subr.mxu1 %v1675_v3 }
  0x9d   : > { %753 = vrot.lane.b32.xlu1 %v2634_v6, %s2537_s14  ;;  %751 = vrot.lane.b32.xlu0 %v2625_v1, %s2537_s14 }
  0x9e   : > { %2326 = vmatpush3.msra.mxu0 %v1675_v3  ;;  %2419 = vmatpush3.msra.mxu1 %v1675_v3  ;;  %v1672_v3 = vld [vmem:[%s4298_s1 + $0x50] sm:$0xff] }
  0x9f   : > { %v3141_v31 = vpop.permute.xlu1 %500  ;;  %v3143_v23 = vpop.permute.xlu0 %498  ;;  %2327 = vmatprep.subr.mxu0 %v1674_v18  ;;  %2404 = vmatprep.subr.mxu1 %v1674_v18 }
  0xa0   : > { %2328 = vmatpush3.msra.mxu0 %v1674_v18  ;;  %2420 = vmatpush3.msra.mxu1 %v1674_v18  ;;  %v1671_v18 = vld [vmem:[%s4298_s1 + $0x48] sm:$0xff] }
  0xa1   : > { %757 = vrot.lane.b32.xlu1 %v2678_v30, %s2537_s14  ;;  %755 = vrot.lane.b32.xlu0 %v2685_v33, %s2537_s14 }
  0xa2   : > { %2329 = vmatprep.subr.mxu0 %v1673_v53  ;;  %2405 = vmatprep.subr.mxu1 %v1673_v53 }
  0xa3   : > { %v3149_v0 = vpop.permute.xlu1 %504  ;;  %v3151_v2 = vpop.permute.xlu0 %502  ;;  %2330 = vmatpush3.msra.mxu0 %v1673_v53  ;;  %2421 = vmatpush3.msra.mxu1 %v1673_v53  ;;  %v1670_v53 = vld [vmem:[%s4298_s1 + $0x40] sm:$0xff] }
  0xa4   : > { %2331 = vmatprep.subr.mxu0 %v1672_v3  ;;  %2406 = vmatprep.subr.mxu1 %v1672_v3 }
  0xa5   : > { %761 = vrot.lane.b32.xlu1 %v2696_v40, %s2537_s14  ;;  %759 = vrot.lane.b32.xlu0 %v2682_v32, %s2537_s14 }
  0xa6   : > { %2332 = vmatpush3.msra.mxu0 %v1672_v3  ;;  %2422 = vmatpush3.msra.mxu1 %v1672_v3  ;;  %v1669_v3 = vld [vmem:[%s4298_s1 + $0x38] sm:$0xff] }
  0xa7   : > { %v3157_v1 = vpop.permute.xlu1 %508  ;;  %v3159_v63 = vpop.permute.xlu0 %506  ;;  %2333 = vmatprep.subr.mxu0 %v1671_v18  ;;  %2407 = vmatprep.subr.mxu1 %v1671_v18 }
  0xa8   : > { %2334 = vmatpush3.msra.mxu0 %v1671_v18  ;;  %2423 = vmatpush3.msra.mxu1 %v1671_v18  ;;  %v1668_v18 = vld [vmem:[%s4298_s1 + $0x30] sm:$0xff] }
  0xa9   : > { %765 = vrot.lane.b32.xlu1 %v2712_v46, %s2537_s14  ;;  %763 = vrot.lane.b32.xlu0 %v2718_v48, %s2537_s14 }
  0xaa   : > { %2335 = vmatprep.subr.mxu0 %v1670_v53  ;;  %2408 = vmatprep.subr.mxu1 %v1670_v53 }
  0xab   : > { %v3165_v34 = vpop.permute.xlu1 %512  ;;  %v3167_v55 = vpop.permute.xlu0 %510  ;;  %2336 = vmatpush3.msra.mxu0 %v1670_v53  ;;  %2424 = vmatpush3.msra.mxu1 %v1670_v53 }
  0xac   : > { %2337 = vmatprep.subr.mxu0 %v1669_v3  ;;  %2409 = vmatprep.subr.mxu1 %v1669_v3 }
  0xad   : > { %769 = vrot.lane.b32.xlu1 %v2734_v54, %s2537_s14  ;;  %767 = vrot.lane.b32.xlu0 %v2715_v47, %s2537_s14 }
  0xae   : > { %2338 = vmatpush3.msra.mxu0 %v1669_v3  ;;  %2425 = vmatpush3.msra.mxu1 %v1669_v3 }
  0xaf   : > { %v3173_v17 = vpop.permute.xlu1 %516  ;;  %v3175_v29 = vpop.permute.xlu0 %514  ;;  %2339 = vmatprep.subr.mxu0 %v1668_v18  ;;  %2410 = vmatprep.subr.mxu1 %v1668_v18 }
  0xb0   : > { %2340 = vmatpush3.msra.mxu0 %v1668_v18  ;;  %2426 = vmatpush3.msra.mxu1 %v1668_v18  ;;  %v1665_v18 = vld [vmem:[%s4298_s1 + $0x18] sm:$0xff] }
  0xb1   : > { %773 = vrot.lane.b32.xlu1 %v2752_v60, %s2537_s14  ;;  %771 = vrot.lane.b32.xlu0 %v2758_v62, %s2537_s14 }
  0xb3   : > { %v3187_v21 = vpop.permute.xlu1 %520  ;;  %v3189_v16 = vpop.permute.xlu0 %518 }
  0xb5   : > { %777 = vrot.lane.b32.xlu1 %v2774_v9, %s2537_s14  ;;  %775 = vrot.lane.b32.xlu0 %v2755_v61, %s2537_s14 }
  0xb7   : > { %v3198_v4 = vpop.permute.xlu1 %524  ;;  %v3200_v44 = vpop.permute.xlu0 %522 }
  0xb9   : > { %781 = vrot.lane.b32.xlu1 %v2792_v22, %s2537_s14  ;;  %779 = vrot.lane.b32.xlu0 %v2798_v26, %s2537_s14 }
  0xbb   : > { %v3212_v28 = vpop.permute.xlu1 %528  ;;  %v3214_v41 = vpop.permute.xlu0 %526 }
  0xbd   : > { %785 = vrot.lane.b32.xlu1 %v2814_v35, %s2537_s14  ;;  %783 = vrot.lane.b32.xlu0 %v2795_v25, %s2537_s14 }
  0xbf   : > { %v3223_v58 = vpop.permute.xlu1 %532  ;;  %v3225_v39 = vpop.permute.xlu0 %530 }
  0xc0   : > { %4440 = vst [vmem:[#allocation55_spill] sm:$0xff] %v3225_v39 }
  0xc1   : > { %789 = vrot.lane.b32.xlu1 %v2832_v45, %s2537_s14  ;;  %787 = vrot.lane.b32.xlu0 %v2838_v52, %s2537_s14 }
  0xc3   : > { %v3237_v19 = vpop.permute.xlu1 %536  ;;  %v3239_v39 = vpop.permute.xlu0 %534 }
  0xc4   : > { %4441 = vst [vmem:[#allocation56_spill] sm:$0xff] %v3237_v19  ;;  %4442 = vst [vmem:[#allocation57_spill] sm:$0xff] %v3239_v39 }
  0xc5   : > { %853 = vrot.lane.b32.xlu1 %v2645_v11, %s2538_s27  ;;  %791 = vrot.lane.b32.xlu0 %v2835_v49, %s2537_s14  ;;  %v1667_v11 = vld [vmem:[%s4298_s1 + $0x28] sm:$0xff] }
  0xc6   : > { %2341 = vmatprep.subr.mxu0 %v1667_v11  ;;  %2411 = vmatprep.subr.mxu1 %v1667_v11 }
  0xc7   : > { %v3248_v19 = vpop.permute.xlu1 %540  ;;  %v3250_v39 = vpop.permute.xlu0 %538  ;;  %2342 = vmatpush3.msra.mxu0 %v1667_v11  ;;  %2427 = vmatpush3.msra.mxu1 %v1667_v11 }
  0xc8   : > { %4443 = vst [vmem:[#allocation58_spill] sm:$0xff] %v3250_v39 }
  0xc9   : > { %958 = vrot.lane.b32.xlu1 %v2946_v38, %s2539_s30  ;;  %855 = vrot.lane.b32.xlu0 %v2642_v10, %s2538_s27  ;;  %v1666_v38 = vld [vmem:[%s4298_s1 + $0x20] sm:$0xff] }
  0xca   : > { %2343 = vmatprep.subr.mxu0 %v1666_v38  ;;  %2412 = vmatprep.subr.mxu1 %v1666_v38 }
  0xcb   : > { %v3262_v53 = vpop.permute.xlu1 %649  ;;  %v3264_v39 = vpop.permute.xlu0 %647  ;;  %2344 = vmatpush3.msra.mxu0 %v1666_v38  ;;  %2428 = vmatpush3.msra.mxu1 %v1666_v38  ;;  %v1663_v38 = vld [vmem:[%s4298_s1 + $0x8] sm:$0xff] }
  0xcc   : > { %4444 = vst [vmem:[#allocation59_spill] sm:$0xff] %v3262_v53  ;;  %2345 = vmatprep.subr.mxu0 %v1665_v18  ;;  %2413 = vmatprep.subr.mxu1 %v1665_v18 }
  0xcd   : > { %1058 = vrot.lane.b32.xlu1 %v2685_v33, %s2540_s12  ;;  %960 = vrot.lane.b32.xlu0 %v2943_v27, %s2539_s30  ;;  %v1664_v27 = vld [vmem:[%s4298_s1 + $0x10] sm:$0xff] }
  0xce   : > { %2346 = vmatpush3.msra.mxu0 %v1665_v18  ;;  %2429 = vmatpush3.msra.mxu1 %v1665_v18 }
  0xcf   : > { %v3273_v10 = vpop.permute.xlu1 %653  ;;  %v3275_v3 = vpop.permute.xlu0 %651  ;;  %2347 = vmatprep.subr.mxu0 %v1664_v27  ;;  %2414 = vmatprep.subr.mxu1 %v1664_v27 }
  0xd0   : > { %4445 = vst [vmem:[#allocation60_spill] sm:$0xff] %v3273_v10  ;;  %4446 = vst [vmem:[#allocation61_spill] sm:$0xff] %v3275_v3  ;;  %2348 = vmatpush3.msra.mxu0 %v1664_v27  ;;  %2430 = vmatpush3.msra.mxu1 %v1664_v27  ;;  %v1662_v3 = vld [vmem:[%s4298_s1] sm:$0xff] }
  0xd1   : > { %1164 = vrot.lane.b32.xlu1 %v2707_v43, %s2541_s16  ;;  %1060 = vrot.lane.b32.xlu0 %v2678_v30, %s2540_s12 }
  0xd2   : > { %2349 = vmatprep.subr.mxu0 %v1663_v38  ;;  %2415 = vmatprep.subr.mxu1 %v1663_v38 }
  0xd3   : > { %v3287_v11 = vpop.permute.xlu1 %657  ;;  %v3289_v10 = vpop.permute.xlu0 %655  ;;  %2350 = vmatpush3.msra.mxu0 %v1663_v38  ;;  %2431 = vmatpush3.msra.mxu1 %v1663_v38 }
  0xd4   : > { %4447 = vst [vmem:[#allocation62_spill] sm:$0xff] %v3287_v11  ;;  %4448 = vst [vmem:[#allocation63_spill] sm:$0xff] %v3289_v10  ;;  %v1373_v11 = vsel %vm1365_vm2, %v2634_v6, %v3103_v12  ;;  %2351 = vmatprep.subr.mxu0 %v1662_v3  ;;  %2416 = vmatprep.subr.mxu1 %v1662_v3  ;;  %v1375_v6 = vsel %vm1365_vm2, %v2678_v30, %v3133_v36 }
  0xd5   : > { %1166 = vrot.lane.b32.xlu1 %v2704_v42, %s2541_s16  ;;  %857 = vrot.lane.b32.xlu0 %v2656_v14, %s2538_s27  ;;  %v1374_v14 = vsel %vm1365_vm2, %v2685_v33, %v3135_v37  ;;  %v1377_v30 = vsel %vm1365_vm2, %v2696_v40, %v3141_v31  ;;  %v1376_v33 = vsel %vm1365_vm2, %v2682_v32, %v3143_v23 }
  0xd6   : > { %2352 = vmatpush3.msra.mxu0 %v1662_v3  ;;  %2432 = vmatpush3.msra.mxu1 %v1662_v3  ;;  %v1378_v23 = vsel %vm1365_vm2, %v2718_v48, %v3151_v2 }
  0xd7   : > { %v662_v18 = vpop.permute.xlu1 %661  ;;  %v3301_v10 = vpop.permute.xlu0 %659 }
  0xd8   : > { %v3307_v53 = vsel %vm1398_vm3, %v1373_v11, %v662_v18 }
  0xd9   : > { %859 = vrot.lane.b32.xlu1 %v2653_v13, %s2538_s27  ;;  %1269 = vrot.lane.b32.xlu0 %v2970_v20, %s2542_s10 }
  0xdb   : > { %v666_v12 = vpop.permute.xlu1 %665  ;;  %v664_v27 = vpop.permute.xlu0 %663 }
  0xdc   : > { %v3320_v13 = vsel %vm1398_vm3, %v1375_v6, %v666_v12  ;;  %v3323_v11 = vsel %vm1398_vm3, %v1374_v14, %v664_v27 }
  0xdd   : > { %1271 = vrot.lane.b32.xlu1 %v2967_v7, %s2542_s10  ;;  %962 = vrot.lane.b32.xlu0 %v2954_v15, %s2539_s30  ;;  %v1379_v15 = vsel %vm1365_vm2, %v2712_v46, %v3149_v0 }
  0xdf   : > { %v670_v36 = vpop.permute.xlu1 %669  ;;  %v668_v37 = vpop.permute.xlu0 %667 }
  0xe0   : > { %v3336_v3 = vsel %vm1398_vm3, %v1377_v30, %v670_v36  ;;  %v3339_v38 = vsel %vm1398_vm3, %v1376_v33, %v668_v37 }
  0xe1   : > { %1062 = vrot.lane.b32.xlu1 %v2682_v32, %s2540_s12  ;;  %964 = vrot.lane.b32.xlu0 %v2957_v5, %s2539_s30  ;;  %v1381_v32 = vsel %vm1365_vm2, %v2734_v54, %v3157_v1  ;;  %v1380_v5 = vsel %vm1365_vm2, %v2715_v47, %v3159_v63  ;;  %v1382_v63 = vsel %vm1365_vm2, %v2758_v62, %v3167_v55 }
  0xe2   : > { %v1384_v55 = vsel %vm1365_vm2, %v2755_v61, %v3175_v29 }
  0xe3   : > { %v674_v31 = vpop.permute.xlu1 %673  ;;  %v672_v18 = vpop.permute.xlu0 %671 }
  0xe4   : > { %v3352_v6 = vsel %vm1398_vm3, %v1379_v15, %v674_v31  ;;  %v3355_v14 = vsel %vm1398_vm3, %v1378_v23, %v672_v18 }
  0xe5   : > { %1168 = vrot.lane.b32.xlu1 %v2729_v51, %s2541_s16  ;;  %1064 = vrot.lane.b32.xlu0 %v2696_v40, %s2540_s12  ;;  %v1383_v40 = vsel %vm1365_vm2, %v2752_v60, %v3165_v34 }
  0xe7   : > { %v678_v0 = vpop.permute.xlu1 %677  ;;  %v676_v2 = vpop.permute.xlu0 %675 }
  0xe8   : > { %v3368_v12 = vsel %vm1398_vm3, %v1381_v32, %v678_v0  ;;  %v3371_v27 = vsel %vm1398_vm3, %v1380_v5, %v676_v2 }
  0xe9   : > { %1170 = vrot.lane.b32.xlu1 %v2726_v50, %s2541_s16  ;;  %861 = vrot.lane.b32.xlu0 %v2707_v43, %s2538_s27  ;;  %v1385_v43 = vsel %vm1365_vm2, %v2774_v9, %v3173_v17  ;;  %v1386_v17 = vsel %vm1365_vm2, %v2798_v26, %v3189_v16  ;;  %v1388_v16 = vsel %vm1365_vm2, %v2795_v25, %v3200_v44 }
  0xeb   : > { %v682_v1 = vpop.permute.xlu1 %681  ;;  %v680_v30 = vpop.permute.xlu0 %679 }
  0xec   : > { %v3384_v33 = vsel %vm1398_vm3, %v1383_v40, %v682_v1  ;;  %v3387_v36 = vsel %vm1398_vm3, %v1382_v63, %v680_v30  ;;  %v4456_v1 = vld [vmem:[#allocation56_spill] sm:$0xff]  ;;  %v4458_v30 = vld [vmem:[#allocation57_spill] sm:$0xff] }
  0xed   : > { %863 = vrot.lane.b32.xlu1 %v2704_v42, %s2538_s27  ;;  %1273 = vrot.lane.b32.xlu0 %v2983_v59, %s2542_s10  ;;  %v1387_v42 = vsel %vm1365_vm2, %v2792_v22, %v3187_v21  ;;  %v1389_v21 = vsel %vm1365_vm2, %v2814_v35, %v3198_v4  ;;  %v1390_v4 = vsel %vm1365_vm2, %v2838_v52, %v3214_v41 }
  0xef   : > { %v686_v34 = vpop.permute.xlu1 %685  ;;  %v684_v37 = vpop.permute.xlu0 %683 }
  0xf0   : > { %v3400_v15 = vsel %vm1398_vm3, %v1385_v43, %v686_v34  ;;  %v3403_v23 = vsel %vm1398_vm3, %v1384_v55, %v684_v37 }
  0xf1   : > { %1275 = vrot.lane.b32.xlu1 %v2980_v24, %s2542_s10  ;;  %966 = vrot.lane.b32.xlu0 %v2970_v20, %s2539_s30 }
  0xf3   : > { %v690_v29 = vpop.permute.xlu1 %689  ;;  %v688_v31 = vpop.permute.xlu0 %687 }
  0xf4   : > { %v3416_v18 = vsel %vm1398_vm3, %v1387_v42, %v690_v29  ;;  %v3419_v32 = vsel %vm1398_vm3, %v1386_v17, %v688_v31  ;;  %v4463_v17 = vld [vmem:[#allocation23_spill] sm:$0xff]  ;;  %v4464_v31 = vld [vmem:[#allocation58_spill] sm:$0xff] }
  0xf5   : > { %1066 = vrot.lane.b32.xlu1 %v2718_v48, %s2540_s12  ;;  %968 = vrot.lane.b32.xlu0 %v2967_v7, %s2539_s30  ;;  %v1391_v48 = vsel %vm1365_vm2, %v2832_v45, %v3212_v28  ;;  %v4452_v28 = vld [vmem:[#allocation55_spill] sm:$0xff]  ;;  %v1397_v29 = vsel %vm1365_vm2, %v4463_v17, %v3248_v19 }
  0xf6   : > { %v1392_v45 = vsel %vm1365_vm2, %v2835_v49, %v4452_v28  ;;  %v4459_v49 = vld [vmem:[#allocation20_spill] sm:$0xff]  ;;  %v4469_v28 = vld [vmem:[#allocation6_spill] sm:$0xff] }
  0xf7   : > { %v694_v20 = vpop.permute.xlu1 %693  ;;  %v692_v5 = vpop.permute.xlu0 %691  ;;  %v1394_v43 = vsel %vm1365_vm2, %v4459_v49, %v4458_v30  ;;  %v4473_v49 = vld [vmem:[#allocation8_spill] sm:$0xff] }
  0xf8   : > { %v3432_v0 = vsel %vm1398_vm3, %v1389_v21, %v694_v20  ;;  %v3435_v2 = vsel %vm1398_vm3, %v1388_v16, %v692_v5  ;;  %v4465_v21 = vld [vmem:[#allocation19_spill] sm:$0xff] }
  0xf9   : > { %4449 = vst [vmem:[#allocation64_spill] sm:$0xff] %v3432_v0  ;;  %1172 = vrot.lane.b32.xlu1 %v2747_v57, %s2541_s16  ;;  %1068 = vrot.lane.b32.xlu0 %v2712_v46, %s2540_s12  ;;  %v1393_v46 = vsel %vm1365_vm2, %v2854_v8, %v3223_v58  ;;  %v4457_v58 = vld [vmem:[#allocation18_spill] sm:$0xff]  ;;  %v1396_v16 = vsel %vm1365_vm2, %v4465_v21, %v4464_v31 }
  0xfa   : > { %v1395_v8 = vsel %vm1365_vm2, %v4457_v58, %v4456_v1 }
  0xfb   : > { %v698_v25 = vpop.permute.xlu1 %697  ;;  %v696_v35 = vpop.permute.xlu0 %695 }
  0xfc   : > { %v3448_v44 = vsel %vm1398_vm3, %v1391_v48, %v698_v25  ;;  %v3451_v7 = vsel %vm1398_vm3, %v1390_v4, %v696_v35  ;;  %v4468_v25 = vld [vmem:[#allocation7_spill] sm:$0xff] }
  0xfd   : > { %4450 = vst [vmem:[#allocation65_spill] sm:$0xff] %v3448_v44  ;;  %4451 = vst [vmem:[#allocation66_spill] sm:$0xff] %v3451_v7  ;;  %1174 = vrot.lane.b32.xlu1 %v2744_v56, %s2541_s16  ;;  %865 = vrot.lane.b32.xlu0 %v2729_v51, %s2538_s27  ;;  %v4455_v51 = vld [vmem:[#allocation29_spill] sm:$0xff] }
  0xff   : > { %v702_v52 = vpop.permute.xlu1 %701  ;;  %v700_v41 = vpop.permute.xlu0 %699 }
 0x100   : > { %v3464_v40 = vsel %vm1398_vm3, %v1393_v46, %v702_v52  ;;  %v3467_v63 = vsel %vm1398_vm3, %v1392_v45, %v700_v41  ;;  %v4470_v45 = vld [vmem:[#allocation31_spill] sm:$0xff]  ;;  %v4471_v41 = vld [vmem:[#allocation30_spill] sm:$0xff] }
 0x101   : > { %4453 = vst [vmem:[#allocation55_spill] sm:$0xff] %v3464_v40  ;;  %4454 = vst [vmem:[#allocation67_spill] sm:$0xff] %v3467_v63  ;;  %867 = vrot.lane.b32.xlu1 %v2726_v50, %s2538_s27  ;;  %1277 = vrot.lane.b32.xlu0 %v4455_v51, %s2542_s10  ;;  %v4462_v50 = vld [vmem:[#allocation28_spill] sm:$0xff] }
 0x103   : > { %v706_v55 = vpop.permute.xlu1 %705  ;;  %v704_v34 = vpop.permute.xlu0 %703 }
 0x104   : > { %v3480_v37 = vsel %vm1398_vm3, %v1395_v8, %v706_v55  ;;  %v3483_v42 = vsel %vm1398_vm3, %v1394_v43, %v704_v34  ;;  %v4472_v8 = vld [vmem:[#allocation9_spill] sm:$0xff] }
 0x105   : > { %4460 = vst [vmem:[#allocation29_spill] sm:$0xff] %v3480_v37  ;;  %4461 = vst [vmem:[#allocation56_spill] sm:$0xff] %v3483_v42  ;;  %1279 = vrot.lane.b32.xlu1 %v4462_v50, %s2542_s10  ;;  %970 = vrot.lane.b32.xlu0 %v2983_v59, %s2539_s30  ;;  %v4474_v55 = vld [vmem:[#allocation33_spill] sm:$0xff]  ;;  %v4481_v42 = vld [vmem:[#allocation4_spill] sm:$0xff] }
 0x107   : > { %v710_v20 = vpop.permute.xlu1 %709  ;;  %v708_v5 = vpop.permute.xlu0 %707 }
 0x108   : > { %v3496_v48 = vsel %vm1398_vm3, %v1397_v29, %v710_v20  ;;  %v3499_v4 = vsel %vm1398_vm3, %v1396_v16, %v708_v5  ;;  %v4476_v16 = vld [vmem:[#allocation11_spill] sm:$0xff] }
 0x109   : > { %4466 = vst [vmem:[#allocation18_spill] sm:$0xff] %v3496_v48  ;;  %4467 = vst [vmem:[#allocation57_spill] sm:$0xff] %v3499_v4  ;;  %1070 = vrot.lane.b32.xlu1 %v2715_v47, %s2540_s12  ;;  %972 = vrot.lane.b32.xlu0 %v2980_v24, %s2539_s30 }
 0x10b   : > { %v3505_v59 = vpop.permute.xlu1 %749  ;;  %v3507_v19 = vpop.permute.xlu0 %747 }
 0x10d   : > { %1176 = vrot.lane.b32.xlu1 %v4468_v25, %s2541_s16  ;;  %1072 = vrot.lane.b32.xlu0 %v2734_v54, %s2540_s12 }
 0x10f   : > { %v3513_v35 = vpop.permute.xlu1 %753  ;;  %v3515_v46 = vpop.permute.xlu0 %751 }
 0x111   : > { %1178 = vrot.lane.b32.xlu1 %v4469_v28, %s2541_s16  ;;  %869 = vrot.lane.b32.xlu0 %v2747_v57, %s2538_s27 }
 0x113   : > { %v3521_v47 = vpop.permute.xlu1 %757  ;;  %v3523_v24 = vpop.permute.xlu0 %755 }
 0x115   : > { %871 = vrot.lane.b32.xlu1 %v2744_v56, %s2538_s27  ;;  %1281 = vrot.lane.b32.xlu0 %v4470_v45, %s2542_s10 }
 0x117   : > { %v3529_v54 = vpop.permute.xlu1 %761  ;;  %v3531_v52 = vpop.permute.xlu0 %759 }
 0x119   : > { %1283 = vrot.lane.b32.xlu1 %v4471_v41, %s2542_s10  ;;  %974 = vrot.lane.b32.xlu0 %v4455_v51, %s2539_s30 }
 0x11b   : > { %v3537_v57 = vpop.permute.xlu1 %765  ;;  %v3539_v1 = vpop.permute.xlu0 %763 }
 0x11d   : > { %1074 = vrot.lane.b32.xlu1 %v2758_v62, %s2540_s12  ;;  %976 = vrot.lane.b32.xlu0 %v4462_v50, %s2539_s30  ;;  %v4475_v50 = vld [vmem:[#allocation32_spill] sm:$0xff] }
 0x11f   : > { %v3545_v56 = vpop.permute.xlu1 %769  ;;  %v3547_v58 = vpop.permute.xlu0 %767 }
 0x121   : > { %1180 = vrot.lane.b32.xlu1 %v4472_v8, %s2541_s16  ;;  %1076 = vrot.lane.b32.xlu0 %v2752_v60, %s2540_s12 }
 0x123   : > { %v3553_v51 = vpop.permute.xlu1 %773  ;;  %v3555_v30 = vpop.permute.xlu0 %771 }
 0x125   : > { %1182 = vrot.lane.b32.xlu1 %v4473_v49, %s2541_s16  ;;  %873 = vrot.lane.b32.xlu0 %v4468_v25, %s2538_s27  ;;  %v4477_v25 = vld [vmem:[#allocation10_spill] sm:$0xff] }
 0x127   : > { %v3561_v62 = vpop.permute.xlu1 %777  ;;  %v3563_v43 = vpop.permute.xlu0 %775 }
 0x129   : > { %875 = vrot.lane.b32.xlu1 %v4469_v28, %s2538_s27  ;;  %1285 = vrot.lane.b32.xlu0 %v4474_v55, %s2542_s10 }
 0x12b   : > { %v3569_v60 = vpop.permute.xlu1 %781  ;;  %v3571_v34 = vpop.permute.xlu0 %779 }
 0x12d   : > { %1287 = vrot.lane.b32.xlu1 %v4475_v50, %s2542_s10  ;;  %978 = vrot.lane.b32.xlu0 %v4470_v45, %s2539_s30  ;;  %v4478_v45 = vld [vmem:[#allocation35_spill] sm:$0xff] }
 0x12f   : > { %v3577_v17 = vpop.permute.xlu1 %785  ;;  %v3579_v29 = vpop.permute.xlu0 %783 }
 0x131   : > { %1078 = vrot.lane.b32.xlu1 %v2755_v61, %s2540_s12  ;;  %980 = vrot.lane.b32.xlu0 %v4471_v41, %s2539_s30 }
 0x133   : > { %v3585_v31 = vpop.permute.xlu1 %789  ;;  %v3587_v21 = vpop.permute.xlu0 %787 }
 0x135   : > { %1184 = vrot.lane.b32.xlu1 %v4476_v16, %s2541_s16  ;;  %1080 = vrot.lane.b32.xlu0 %v2774_v9, %s2540_s12  ;;  %v4479_v9 = vld [vmem:[#allocation34_spill] sm:$0xff] }
 0x137   : > { %v854_v20 = vpop.permute.xlu1 %853  ;;  %v3593_v5 = vpop.permute.xlu0 %791 }
 0x139   : > { %1186 = vrot.lane.b32.xlu1 %v4477_v25, %s2541_s16  ;;  %877 = vrot.lane.b32.xlu0 %v4472_v8, %s2538_s27  ;;  %v4480_v8 = vld [vmem:[#allocation52_spill] sm:$0xff] }
 0x13a   : > { %v1366_v40 = vsel %vm1365_vm2, %v4481_v42, %v4480_v8  ;;  %v4482_v42 = vld [vmem:[#allocation54_spill] sm:$0xff]  ;;  %v4483_v8 = vld [vmem:[#allocation5_spill] sm:$0xff] }
 0x13b   : > { %v959_v61 = vpop.permute.xlu1 %958  ;;  %v856_v28 = vpop.permute.xlu0 %855 }
 0x13d   : > { %879 = vrot.lane.b32.xlu1 %v4473_v49, %s2538_s27  ;;  %1289 = vrot.lane.b32.xlu0 %v4478_v45, %s2542_s10  ;;  %v1399_v49 = vsel %vm1398_vm3, %v1366_v40, %v3264_v39  ;;  %v4485_v39 = vld [vmem:[#allocation59_spill] sm:$0xff] }
 0x13f   : > { %v1059_v41 = vpop.permute.xlu1 %1058  ;;  %v961_v48 = vpop.permute.xlu0 %960 }
 0x141   : > { %1291 = vrot.lane.b32.xlu1 %v4479_v9, %s2542_s10  ;;  %982 = vrot.lane.b32.xlu0 %v4474_v55, %s2539_s30  ;;  %v1432_v55 = vsel %vm1431_vm4, %v1399_v49, %v3507_v19 }
 0x142   : > { %v1465_v7 = vsel %vm1464_vm5, %v1432_v55, %v854_v20 }
 0x143   : > { %v1165_v4 = vpop.permute.xlu1 %1164  ;;  %v1061_v37 = vpop.permute.xlu0 %1060  ;;  %v1498_v0 = vsel %vm1497_vm6, %v1465_v7, %v959_v61 }
 0x144   : > { %v1531_v19 = vsel %vm1530_vm7, %v1498_v0, %v1059_v41 }
 0x145   : > { %1082 = vrot.lane.b32.xlu1 %v2798_v26, %s2540_s12  ;;  %984 = vrot.lane.b32.xlu0 %v4475_v50, %s2539_s30  ;;  %v1367_v26 = vsel %vm1365_vm2, %v4483_v8, %v4482_v42  ;;  %v4484_v50 = vld [vmem:[#allocation13_spill] sm:$0xff]  ;;  %v1564_v49 = vsel %vm1563_vm8, %v1531_v19, %v1165_v4  ;;  %v4486_v8 = vld [vmem:[#allocation12_spill] sm:$0xff]  ;;  %v4490_v19 = vld [vmem:[#allocation2_spill] sm:$0xff] }
 0x146   : > { %v1400_v40 = vsel %vm1398_vm3, %v1367_v26, %v4485_v39 }
 0x147   : > { %v1167_v63 = vpop.permute.xlu1 %1166  ;;  %v858_v44 = vpop.permute.xlu0 %857  ;;  %v1433_v20 = vsel %vm1431_vm4, %v1400_v40, %v3505_v59  ;;  %v4489_v40 = vld [vmem:[#allocation51_spill] sm:$0xff] }
 0x148   : > { %v1466_v7 = vsel %vm1464_vm5, %v1433_v20, %v856_v28  ;;  %v2482_v20 = vld [vmem:[%s2619_s8 + $0xb0] sm:$0xff] }
 0x149   : > { %1188 = vrot.lane.b32.xlu1 %v4484_v50, %s2541_s16  ;;  %1084 = vrot.lane.b32.xlu0 %v2792_v22, %s2540_s12  ;;  %v1499_v22 = vsel %vm1497_vm6, %v1466_v7, %v961_v48  ;;  %v4487_v48 = vld [vmem:[#allocation37_spill] sm:$0xff] }
 0x14a   : > { %v1532_v0 = vsel %vm1530_vm7, %v1499_v22, %v1061_v37  ;;  %v4488_v37 = vld [vmem:[#allocation36_spill] sm:$0xff] }
 0x14b   : > { %v860_v55 = vpop.permute.xlu1 %859  ;;  %v1270_v42 = vpop.permute.xlu0 %1269  ;;  %v1565_v4 = vsel %vm1563_vm8, %v1532_v0, %v1167_v63  ;;  %v4492_v0 = vld [vmem:[#allocation53_spill] sm:$0xff] }
 0x14c   : > { %v1597_v61 = vsel %vm1596_vm9, %v1564_v49, %v1270_v42  ;;  %v4491_v49 = vld [vmem:[#allocation61_spill] sm:$0xff] }
 0x14d   : > { %1190 = vrot.lane.b32.xlu1 %v4486_v8, %s2541_s16  ;;  %881 = vrot.lane.b32.xlu0 %v4476_v16, %s2538_s27 }
 0x14e   : > { %2353 = vmatprep.mubr.msk.f32.mxu0 %vm1629_vm10, %v1597_v61 }
 0x14f   : > { %v1272_v59 = vpop.permute.xlu1 %1271  ;;  %v963_v41 = vpop.permute.xlu0 %962 }
 0x150   : > { %v1598_v28 = vsel %vm1596_vm9, %v1565_v4, %v1272_v59  ;;  %v4493_v4 = vld [vmem:[#allocation3_spill] sm:$0xff] }
 0x151   : > { %883 = vrot.lane.b32.xlu1 %v4477_v25, %s2538_s27  ;;  %1293 = vrot.lane.b32.xlu0 %v4487_v48, %s2542_s10  ;;  %v1368_v25 = vsel %vm1365_vm2, %v4490_v19, %v4489_v40  ;;  %v1369_v59 = vsel %vm1365_vm2, %v4493_v4, %v4492_v0  ;;  %v4494_v40 = vld [vmem:[#allocation15_spill] sm:$0xff]  ;;  %v4495_v19 = vld [vmem:[#allocation60_spill] sm:$0xff]  ;;  %v4496_v0 = vld [vmem:[#allocation14_spill] sm:$0xff] }
 0x152   : > { %2354 = vmatmul.mubr.msk.f32.vlgmr.msra.gmra.mxu0 %vm1629_vm10, %v1598_v28  ;;  %v1401_v42 = vsel %vm1398_vm3, %v1368_v25, %v4491_v49  ;;  %v1402_v25 = vsel %vm1398_vm3, %v1369_v59, %v4495_v19  ;;  %v4498_v59 = vld [vmem:[#allocation38_spill] sm:$0xff]  ;;  %v4499_v19 = vld [vmem:[#allocation45_spill] sm:$0xff] }
 0x153   : > { %v1063_v16 = vpop.permute.xlu1 %1062  ;;  %v965_v26 = vpop.permute.xlu0 %964  ;;  %v1434_v7 = vsel %vm1431_vm4, %v1401_v42, %v3515_v46 }
 0x154   : > { %v1467_v22 = vsel %vm1464_vm5, %v1434_v7, %v858_v44  ;;  %v1435_v44 = vsel %vm1431_vm4, %v1402_v25, %v3513_v35  ;;  %v2485_v25 = vld [vmem:[%s2619_s8 + $0xc8] sm:$0xff] }
 0x155   : > { %1295 = vrot.lane.b32.xlu1 %v4488_v37, %s2542_s10  ;;  %986 = vrot.lane.b32.xlu0 %v4478_v45, %s2539_s30  ;;  %v1500_v28 = vsel %vm1497_vm6, %v1467_v22, %v963_v41  ;;  %v1468_v41 = vsel %vm1464_vm5, %v1435_v44, %v860_v55 }
 0x156   : > { %v1533_v46 = vsel %vm1530_vm7, %v1500_v28, %v1063_v16  ;;  %v1501_v22 = vsel %vm1497_vm6, %v1468_v41, %v965_v26  ;;  %v4497_v26 = vld [vmem:[#allocation39_spill] sm:$0xff] }
 0x157   : > { %v1169_v63 = vpop.permute.xlu1 %1168  ;;  %v1065_v39 = vpop.permute.xlu0 %1064 }
 0x158   : > { %v1534_v16 = vsel %vm1530_vm7, %v1501_v22, %v1065_v39  ;;  %v4501_v22 = vld [vmem:[#allocation44_spill] sm:$0xff] }
 0x159   : > { %1086 = vrot.lane.b32.xlu1 %v2482_v20, %s2540_s12  ;;  %988 = vrot.lane.b32.xlu0 %v4479_v9, %s2539_s30  ;;  %v2483_v9 = vld [vmem:[%s2619_s8 + $0xb8] sm:$0xff]  ;;  %v1566_v20 = vsel %vm1563_vm8, %v1533_v46, %v1169_v63  ;;  %v4500_v46 = vld [vmem:[#allocation63_spill] sm:$0xff] }
 0x15b   : > { %v1171_v61 = vpop.permute.xlu1 %1170  ;;  %v862_v45 = vpop.permute.xlu0 %861 }
 0x15c   : > { %v1567_v35 = vsel %vm1563_vm8, %v1534_v16, %v1171_v61 }
 0x15d   : > { %1192 = vrot.lane.b32.xlu1 %v4494_v40, %s2541_s16  ;;  %1088 = vrot.lane.b32.xlu0 %v2483_v9, %s2540_s12  ;;  %v2484_v9 = vld [vmem:[%s2619_s8] sm:$0xff] }
 0x15f   : > { %v864_v49 = vpop.permute.xlu1 %863  ;;  %v1274_v42 = vpop.permute.xlu0 %1273 }
 0x160   : > { %v1599_v7 = vsel %vm1596_vm9, %v1566_v20, %v1274_v42 }
 0x161   : > { %1194 = vrot.lane.b32.xlu1 %v4496_v0, %s2541_s16  ;;  %885 = vrot.lane.b32.xlu0 %v4484_v50, %s2538_s27 }
 0x162   : > { %2356 = vmatprep.mubr.msk.f32.mxu0 %vm1629_vm10, %v1599_v7  ;;  %v2486_v7 = vld [vmem:[%s2619_s8 + $0x8] sm:$0xff] }
 0x163   : > { %v1276_v63 = vpop.permute.xlu1 %1275  ;;  %v967_v55 = vpop.permute.xlu0 %966  ;;  %v1371_v16 = vsel %vm1365_vm2, %v2486_v7, %v4501_v22 }
 0x164   : > { %v1600_v4 = vsel %vm1596_vm9, %v1567_v35, %v1276_v63  ;;  %v4502_v63 = vld [vmem:[#allocation17_spill] sm:$0xff] }
 0x165   : > { %887 = vrot.lane.b32.xlu1 %v4486_v8, %s2538_s27  ;;  %1297 = vrot.lane.b32.xlu0 %v4497_v26, %s2542_s10  ;;  %v1370_v8 = vsel %vm1365_vm2, %v2484_v9, %v4499_v19 }
 0x166   : > { %2357 = vmatmul.mubr.msk.f32.gmra.mxu0 %vm1629_vm10, %v1600_v4  ;;  %v1403_v44 = vsel %vm1398_vm3, %v1370_v8, %v4500_v46  ;;  %v4503_v4 = vld [vmem:[#allocation62_spill] sm:$0xff] }
 0x167   : > { %v1067_v50 = vpop.permute.xlu1 %1066  ;;  %v969_v39 = vpop.permute.xlu0 %968  ;;  %v1436_v20 = vsel %vm1431_vm4, %v1403_v44, %v3523_v24  ;;  %v1404_v9 = vsel %vm1398_vm3, %v1371_v16, %v4503_v4  ;;  %v2488_v16 = vld [vmem:[%s2619_s8 + $0x10] sm:$0xff] }
 0x168   : > { %v1469_v41 = vsel %vm1464_vm5, %v1436_v20, %v862_v45  ;;  %v1437_v45 = vsel %vm1431_vm4, %v1404_v9, %v3521_v47  ;;  %v4504_v20 = vld [vmem:[#allocation16_spill] sm:$0xff] }
 0x169   : > { %1299 = vrot.lane.b32.xlu1 %v4498_v59, %s2542_s10  ;;  %990 = vrot.lane.b32.xlu0 %v4487_v48, %s2539_s30  ;;  %v1502_v35 = vsel %vm1497_vm6, %v1469_v41, %v967_v55  ;;  %v1470_v55 = vsel %vm1464_vm5, %v1437_v45, %v864_v49 }
 0x16a   : > { %v1535_v24 = vsel %vm1530_vm7, %v1502_v35, %v1067_v50  ;;  %v1503_v44 = vsel %vm1497_vm6, %v1470_v55, %v969_v39  ;;  %v4505_v39 = vld [vmem:[#allocation41_spill] sm:$0xff]  ;;  %v4507_v35 = vld [vmem:[#allocation48_spill] sm:$0xff]  ;;  %v2490_v55 = vld [vmem:[%s2619_s8 + $0xe0] sm:$0xff] }
 0x16b   : > { %v1173_v61 = vpop.permute.xlu1 %1172  ;;  %v1069_v28 = vpop.permute.xlu0 %1068 }
 0x16c   : > { %v1568_v19 = vsel %vm1563_vm8, %v1535_v24, %v1173_v61  ;;  %v1536_v50 = vsel %vm1530_vm7, %v1503_v44, %v1069_v28  ;;  %v4506_v28 = vld [vmem:[#allocation40_spill] sm:$0xff] }
 0x16d   : > { %1090 = vrot.lane.b32.xlu1 %v2485_v25, %s2540_s12  ;;  %992 = vrot.lane.b32.xlu0 %v4488_v37, %s2539_s30  ;;  %v2487_v37 = vld [vmem:[%s2619_s8 + $0xd0] sm:$0xff] }
 0x16f   : > { %v1175_v48 = vpop.permute.xlu1 %1174  ;;  %v866_v42 = vpop.permute.xlu0 %865 }
 0x170   : > { %v1569_v47 = vsel %vm1563_vm8, %v1536_v50, %v1175_v48 }
 0x171   : > { %1196 = vrot.lane.b32.xlu1 %v4502_v63, %s2541_s16  ;;  %1092 = vrot.lane.b32.xlu0 %v2487_v37, %s2540_s12  ;;  %v2489_v37 = vld [vmem:[%s2619_s8 + $0xd8] sm:$0xff] }
 0x173   : > { %v868_v8 = vpop.permute.xlu1 %867  ;;  %v1278_v25 = vpop.permute.xlu0 %1277 }
 0x174   : > { %v1601_v46 = vsel %vm1596_vm9, %v1568_v19, %v1278_v25  ;;  %v4508_v25 = vld [vmem:[#allocation22_spill] sm:$0xff] }
 0x175   : > { %1198 = vrot.lane.b32.xlu1 %v4504_v20, %s2541_s16  ;;  %889 = vrot.lane.b32.xlu0 %v4494_v40, %s2538_s27 }
 0x176   : > { %2359 = vmatprep.mubr.msk.f32.mxu0 %vm1629_vm10, %v1601_v46 }
 0x177   : > { %v1280_v61 = vpop.permute.xlu1 %1279  ;;  %v971_v49 = vpop.permute.xlu0 %970 }
 0x178   : > { %v1602_v41 = vsel %vm1596_vm9, %v1569_v47, %v1280_v61  ;;  %v4509_v61 = vld [vmem:[#allocation21_spill] sm:$0xff] }
 0x179   : > { %891 = vrot.lane.b32.xlu1 %v4496_v0, %s2538_s27  ;;  %1301 = vrot.lane.b32.xlu0 %v4505_v39, %s2542_s10  ;;  %v1372_v0 = vsel %vm1365_vm2, %v2488_v16, %v4507_v35  ;;  %v2491_v35 = vld [vmem:[%s2619_s8 + $0xf0] sm:$0xff] }
 0x17a   : > { %2360 = vmatmul.mubr.msk.f32.gmra.mxu0 %vm1629_vm10, %v1602_v41  ;;  %v1405_v4 = vsel %vm1398_vm3, %v1372_v0, %v3301_v10  ;;  %v1439_v10 = vsel %vm1431_vm4, %v3307_v53, %v3529_v54 }
 0x17b   : > { %v1071_v40 = vpop.permute.xlu1 %1070  ;;  %v973_v7 = vpop.permute.xlu0 %972  ;;  %v1438_v9 = vsel %vm1431_vm4, %v1405_v4, %v3531_v52 }
 0x17c   : > { %v1471_v45 = vsel %vm1464_vm5, %v1438_v9, %v866_v42  ;;  %v1472_v42 = vsel %vm1464_vm5, %v1439_v10, %v868_v8 }
 0x17d   : > { %1303 = vrot.lane.b32.xlu1 %v4506_v28, %s2542_s10  ;;  %994 = vrot.lane.b32.xlu0 %v4497_v26, %s2539_s30  ;;  %v1504_v19 = vsel %vm1497_vm6, %v1471_v45, %v971_v49  ;;  %v1505_v47 = vsel %vm1497_vm6, %v1472_v42, %v973_v7 }
 0x17f   : > { %v1177_v48 = vpop.permute.xlu1 %1176  ;;  %v1073_v22 = vpop.permute.xlu0 %1072 }
 0x180   : > { %v1538_v49 = vsel %vm1530_vm7, %v1505_v47, %v1073_v22 }
 0x181   : > { %1094 = vrot.lane.b32.xlu1 %v2489_v37, %s2540_s12  ;;  %996 = vrot.lane.b32.xlu0 %v4498_v59, %s2539_s30  ;;  %v1537_v59 = vsel %vm1530_vm7, %v1504_v19, %v1071_v40  ;;  %v4510_v40 = vld [vmem:[#allocation43_spill] sm:$0xff] }
 0x182   : > { %v1570_v52 = vsel %vm1563_vm8, %v1537_v59, %v1177_v48  ;;  %v4511_v48 = vld [vmem:[#allocation42_spill] sm:$0xff] }
 0x183   : > { %v1179_v24 = vpop.permute.xlu1 %1178  ;;  %v870_v26 = vpop.permute.xlu0 %869 }
 0x184   : > { %v1571_v53 = vsel %vm1563_vm8, %v1538_v49, %v1179_v24  ;;  %v2492_v24 = vld [vmem:[%s2619_s8 + $0xf8] sm:$0xff] }
 0x185   : > { %1200 = vrot.lane.b32.xlu1 %v4508_v25, %s2541_s16  ;;  %1096 = vrot.lane.b32.xlu0 %v2490_v55, %s2540_s12 }
 0x187   : > { %v872_v46 = vpop.permute.xlu1 %871  ;;  %v1282_v44 = vpop.permute.xlu0 %1281 }
 0x188   : > { %v1603_v50 = vsel %vm1596_vm9, %v1570_v52, %v1282_v44 }
 0x189   : > { %1202 = vrot.lane.b32.xlu1 %v4509_v61, %s2541_s16  ;;  %893 = vrot.lane.b32.xlu0 %v4502_v63, %s2538_s27 }
 0x18a   : > { %2362 = vmatprep.mubr.msk.f32.mxu0 %vm1629_vm10, %v1603_v50  ;;  %v4514_v50 = vld [vmem:[#allocation24_spill] sm:$0xff] }
 0x18b   : > { %v1284_v54 = vpop.permute.xlu1 %1283  ;;  %v975_v41 = vpop.permute.xlu0 %974 }
 0x18c   : > { %v1604_v8 = vsel %vm1596_vm9, %v1571_v53, %v1284_v54  ;;  %v4515_v53 = vld [vmem:[#allocation46_spill] sm:$0xff]  ;;  %v1442_v54 = vsel %vm1431_vm4, %v3339_v38, %v3547_v58 }
 0x18d   : > { %895 = vrot.lane.b32.xlu1 %v4504_v20, %s2538_s27  ;;  %1305 = vrot.lane.b32.xlu0 %v4510_v40, %s2542_s10  ;;  %v1440_v20 = vsel %vm1431_vm4, %v3323_v11, %v3539_v1 }
 0x18e   : > { %2363 = vmatmul.mubr.msk.f32.gmra.mxu0 %vm1629_vm10, %v1604_v8  ;;  %v1473_v4 = vsel %vm1464_vm5, %v1440_v20, %v870_v26 }
 0x18f   : > { %v1075_v63 = vpop.permute.xlu1 %1074  ;;  %v977_v7 = vpop.permute.xlu0 %976  ;;  %v1506_v9 = vsel %vm1497_vm6, %v1473_v4, %v975_v41 }
 0x190   : > { %v1539_v45 = vsel %vm1530_vm7, %v1506_v9, %v1075_v63 }
 0x191   : > { %1307 = vrot.lane.b32.xlu1 %v4511_v48, %s2542_s10  ;;  %998 = vrot.lane.b32.xlu0 %v4505_v39, %s2539_s30  ;;  %v4512_v39 = vld [vmem:[#allocation25_spill] sm:$0xff] }
 0x193   : > { %v1181_v22 = vpop.permute.xlu1 %1180  ;;  %v1077_v16 = vpop.permute.xlu0 %1076 }
 0x194   : > { %v1572_v11 = vsel %vm1563_vm8, %v1539_v45, %v1181_v22 }
 0x195   : > { %1098 = vrot.lane.b32.xlu1 %v2491_v35, %s2540_s12  ;;  %1000 = vrot.lane.b32.xlu0 %v4506_v28, %s2539_s30  ;;  %v1441_v28 = vsel %vm1431_vm4, %v3320_v13, %v3537_v57 }
 0x196   : > { %v1474_v26 = vsel %vm1464_vm5, %v1441_v28, %v872_v46  ;;  %v4513_v46 = vld [vmem:[#allocation47_spill] sm:$0xff] }
 0x197   : > { %v1183_v0 = vpop.permute.xlu1 %1182  ;;  %v874_v37 = vpop.permute.xlu0 %873  ;;  %v1507_v10 = vsel %vm1497_vm6, %v1474_v26, %v977_v7 }
 0x198   : > { %v1540_v52 = vsel %vm1530_vm7, %v1507_v10, %v1077_v16 }
 0x199   : > { %1204 = vrot.lane.b32.xlu1 %v4512_v39, %s2541_s16  ;;  %1100 = vrot.lane.b32.xlu0 %v2492_v24, %s2540_s12  ;;  %v1573_v13 = vsel %vm1563_vm8, %v1540_v52, %v1183_v0  ;;  %v3868_v52 = vld [vmem:[%s2619_s8 + $0x118] sm:$0xff] }
 0x19b   : > { %v876_v1 = vpop.permute.xlu1 %875  ;;  %v1286_v19 = vpop.permute.xlu0 %1285 }
 0x19c   : > { %v1605_v59 = vsel %vm1596_vm9, %v1572_v11, %v1286_v19  ;;  %v4518_v19 = vld [vmem:[#allocation27_spill] sm:$0xff] }
 0x19d   : > { %897 = vrot.lane.b32.xlu1 %v4508_v25, %s2538_s27  ;;  %793 = vrot.lane.b32.xlu0 %v2490_v55, %s2537_s14 }
 0x19e   : > { %2365 = vmatprep.mubr.msk.f32.mxu0 %vm1629_vm10, %v1605_v59 }
 0x19f   : > { %v1288_v57 = vpop.permute.xlu1 %1287  ;;  %v979_v44 = vpop.permute.xlu0 %978 }
 0x1a0   : > { %v1606_v42 = vsel %vm1596_vm9, %v1573_v13, %v1288_v57  ;;  %v3871_v13 = vld [vmem:[%s2619_s8 + $0x120] sm:$0xff] }
 0x1a1   : > { %1309 = vrot.lane.b32.xlu1 %v4513_v46, %s2542_s10  ;;  %1206 = vrot.lane.b32.xlu0 %v4514_v50, %s2541_s16 }
 0x1a2   : > { %2366 = vmatmul.mubr.msk.f32.gmra.mxu0 %vm1629_vm10, %v1606_v42  ;;  %v4519_v42 = vld [vmem:[#allocation49_spill] sm:$0xff] }
 0x1a3   : > { %v1079_v25 = vpop.permute.xlu1 %1078  ;;  %v981_v55 = vpop.permute.xlu0 %980 }
 0x1a5   : > { %1002 = vrot.lane.b32.xlu1 %v4510_v40, %s2539_s30  ;;  %899 = vrot.lane.b32.xlu0 %v4509_v61, %s2538_s27  ;;  %v1475_v40 = vsel %vm1464_vm5, %v1442_v54, %v874_v37  ;;  %v2493_v61 = vld [vmem:[%s2619_s8 + $0x100] sm:$0xff]  ;;  %v2494_v37 = vld [vmem:[%s2619_s8 + $0x108] sm:$0xff] }
 0x1a6   : > { %v1508_v63 = vsel %vm1497_vm6, %v1475_v40, %v979_v44 }
 0x1a7   : > { %v1185_v47 = vpop.permute.xlu1 %1184  ;;  %v1081_v49 = vpop.permute.xlu0 %1080  ;;  %v1541_v7 = vsel %vm1530_vm7, %v1508_v63, %v1079_v25  ;;  %v3899_v63 = vld [vmem:[%s2619_s8 + $0x128] sm:$0xff] }
 0x1a8   : > { %v1574_v38 = vsel %vm1563_vm8, %v1541_v7, %v1185_v47 }
 0x1a9   : > { %1004 = vrot.lane.b32.xlu1 %v4511_v48, %s2539_s30  ;;  %1311 = vrot.lane.b32.xlu0 %v4515_v53, %s2542_s10  ;;  %v1443_v48 = vsel %vm1431_vm4, %v3336_v3, %v3545_v56 }
 0x1aa   : > { %v1476_v16 = vsel %vm1464_vm5, %v1443_v48, %v876_v1  ;;  %v4517_v1 = vld [vmem:[#allocation50_spill] sm:$0xff]  ;;  %v950_v48 = vrot.slane %v3871_v13, 2 }
 0x1ab   : > { %v1187_v41 = vpop.permute.xlu1 %1186  ;;  %v878_v8 = vpop.permute.xlu0 %877  ;;  %v1509_v0 = vsel %vm1497_vm6, %v1476_v16, %v981_v55 }
 0x1ac   : > { %v1542_v4 = vsel %vm1530_vm7, %v1509_v0, %v1081_v49 }
 0x1ad   : > { %795 = vrot.lane.b32.xlu1 %v2491_v35, %s2537_s14  ;;  %1102 = vrot.lane.b32.xlu0 %v2493_v61, %s2540_s12  ;;  %v4516_v35 = vld [vmem:[#allocation26_spill] sm:$0xff]  ;;  %v1575_v3 = vsel %vm1563_vm8, %v1542_v4, %v1187_v41 }
 0x1af   : > { %v880_v58 = vpop.permute.xlu1 %879  ;;  %v1290_v22 = vpop.permute.xlu0 %1289 }
 0x1b0   : > { %v1607_v20 = vsel %vm1596_vm9, %v1574_v38, %v1290_v22  ;;  %v847_v38 = vrot.slane %v3899_v63, 1 }
 0x1b1   : > { %1208 = vrot.lane.b32.xlu1 %v4516_v35, %s2541_s16  ;;  %1104 = vrot.lane.b32.xlu0 %v2494_v37, %s2540_s12 }
 0x1b2   : > { %2368 = vmatprep.mubr.msk.f32.mxu0 %vm1629_vm10, %v1607_v20 }
 0x1b3   : > { %v1292_v56 = vpop.permute.xlu1 %1291  ;;  %v983_v9 = vpop.permute.xlu0 %982 }
 0x1b4   : > { %v1608_v45 = vsel %vm1596_vm9, %v1575_v3, %v1292_v56  ;;  %v952_v3 = vrot.slane %v3899_v63, 2 }
 0x1b5   : > { %901 = vrot.lane.b32.xlu1 %v4512_v39, %s2538_s27  ;;  %797 = vrot.lane.b32.xlu0 %v2492_v24, %s2537_s14  ;;  %v1444_v39 = vsel %vm1431_vm4, %v3355_v14, %v3555_v30  ;;  %v844_v14 = vrot.slane %v3868_v52, 1  ;;  %v845_v30 = vrot.slane %v3871_v13, 1 }
 0x1b6   : > { %2369 = vmatmul.mubr.msk.f32.gmra.mxu0 %vm1629_vm10, %v1608_v45  ;;  %v1477_v57 = vsel %vm1464_vm5, %v1444_v39, %v878_v8  ;;  %v3942_v39 = vld [vmem:[%s2619_s8 + $0x130] sm:$0xff] }
 0x1b7   : > { %v1083_v28 = vpop.permute.xlu1 %1082  ;;  %v985_v11 = vpop.permute.xlu0 %984  ;;  %v1510_v44 = vsel %vm1497_vm6, %v1477_v57, %v983_v9  ;;  %v3917_v20 = vsel %vm405_vm0, %v845_v30, %v847_v38 }
 0x1b9   : > { %1313 = vrot.lane.b32.xlu1 %v4517_v1, %s2542_s10  ;;  %1210 = vrot.lane.b32.xlu0 %v4518_v19, %s2541_s16 }
 0x1bb   : > { %v1189_v26 = vpop.permute.xlu1 %1188  ;;  %v1085_v59 = vpop.permute.xlu0 %1084 }
 0x1bd   : > { %1006 = vrot.lane.b32.xlu1 %v4513_v46, %s2539_s30  ;;  %903 = vrot.lane.b32.xlu0 %v4514_v50, %s2538_s27  ;;  %v1543_v46 = vsel %vm1530_vm7, %v1510_v44, %v1083_v28  ;;  %v1445_v50 = vsel %vm1431_vm4, %v3352_v6, %v3553_v51  ;;  %v3895_v6 = vsel %vm405_vm0, %v844_v14, %v845_v30 }
 0x1be   : > { %v1576_v25 = vsel %vm1563_vm8, %v1543_v46, %v1189_v26  ;;  %v1478_v49 = vsel %vm1464_vm5, %v1445_v50, %v880_v58  ;;  %v345_v50 = vld [vmem:[%s2619_s8 + $0x138] sm:$0x3]  ;;  %s358_s8 = scvt.s32.f32 %s357_s26 }
 0x1bf   : > { %v1191_v24 = vpop.permute.xlu1 %1190  ;;  %v882_v10 = vpop.permute.xlu0 %881  ;;  %v1511_v54 = vsel %vm1497_vm6, %v1478_v49, %v985_v11  ;;  %v3935_v11 = vsel %vm574_vm1, %v950_v48, %v952_v3 }
 0x1c0   : > { %v1544_v41 = vsel %vm1530_vm7, %v1511_v54, %v1085_v59  ;;  %v1448_v54 = vsel %vm1431_vm4, %v3387_v36, %v3571_v34  ;;  %v956_v36 = vrot.slane %v345_v50, 2  ;;  %v1449_v34 = vsel %vm1431_vm4, %v3384_v33, %v3569_v60 }
 0x1c1   : > { %1008 = vrot.lane.b32.xlu1 %v4515_v53, %s2539_s30  ;;  %1315 = vrot.lane.b32.xlu0 %v4519_v42, %s2542_s10  ;;  %v1577_v51 = vsel %vm1563_vm8, %v1544_v41, %v1191_v24 }
 0x1c3   : > { %v884_v55 = vpop.permute.xlu1 %883  ;;  %v1294_v47 = vpop.permute.xlu0 %1293 }
 0x1c4   : > { %v1609_v53 = vsel %vm1596_vm9, %v1576_v25, %v1294_v47  ;;  %v851_v25 = vrot.slane %v345_v50, 1 }
 0x1c5   : > { %799 = vrot.lane.b32.xlu1 %v2493_v61, %s2537_s14  ;;  %1106 = vrot.lane.b32.xlu0 %v3868_v52, %s2540_s12  ;;  %v949_v61 = vrot.slane %v3868_v52, 2 }
 0x1c6   : > { %2371 = vmatprep.mubr.msk.f32.mxu0 %vm1629_vm10, %v1609_v53 }
 0x1c7   : > { %v1296_v8 = vpop.permute.xlu1 %1295  ;;  %v987_v40 = vpop.permute.xlu0 %986  ;;  %v3914_v16 = vsel %vm574_vm1, %v949_v61, %v950_v48  ;;  %v351_v48 = vld [vmem:[%s3990_s15] sm:$0xff] }
 0x1c8   : > { %v1610_v7 = vsel %vm1596_vm9, %v1577_v51, %v1296_v8 }
 0x1c9   : > { %1212 = vrot.lane.b32.xlu1 %v3895_v6, %s2541_s16  ;;  %1108 = vrot.lane.b32.xlu0 %v3871_v13, %s2540_s12 }
 0x1ca   : > { %2372 = vmatmul.mubr.msk.f32.gmra.mxu0 %vm1629_vm10, %v1610_v7 }
 0x1cb   : > { %v1087_v58 = vpop.permute.xlu1 %1086  ;;  %v989_v22 = vpop.permute.xlu0 %988 }
 0x1cd   : > { %905 = vrot.lane.b32.xlu1 %v4516_v35, %s2538_s27  ;;  %801 = vrot.lane.b32.xlu0 %v2494_v37, %s2537_s14  ;;  %v1446_v35 = vsel %vm1431_vm4, %v3371_v27, %v3563_v43  ;;  %v1447_v27 = vsel %vm1431_vm4, %v3368_v12, %v3561_v62  ;;  %v849_v62 = vrot.slane %v3942_v39, 1 }
 0x1ce   : > { %v1479_v9 = vsel %vm1464_vm5, %v1446_v35, %v882_v10 }
 0x1cf   : > { %v1193_v0 = vpop.permute.xlu1 %1192  ;;  %v1089_v4 = vpop.permute.xlu0 %1088  ;;  %v1512_v45 = vsel %vm1497_vm6, %v1479_v9, %v987_v40  ;;  %v3983_v53 = vsel %vm405_vm0, %v849_v62, %v851_v25 }
 0x1d0   : > { %v1545_v28 = vsel %vm1530_vm7, %v1512_v45, %v1087_v58  ;;  %v352_v58 = vld [vmem:[%s3990_s15 + $0x8] sm:$0xff] }
 0x1d1   : > { %1317 = vrot.lane.b32.xlu1 %v3914_v16, %s2542_s10  ;;  %1214 = vrot.lane.b32.xlu0 %v3917_v20, %s2541_s16  ;;  %v1578_v43 = vsel %vm1563_vm8, %v1545_v28, %v1193_v0 }
 0x1d3   : > { %v1195_v37 = vpop.permute.xlu1 %1194  ;;  %v886_v56 = vpop.permute.xlu0 %885 }
 0x1d4   : > { %v1481_v8 = vsel %vm1464_vm5, %v1448_v54, %v886_v56 }
 0x1d5   : > { %1010 = vrot.lane.b32.xlu1 %v4517_v1, %s2539_s30  ;;  %907 = vrot.lane.b32.xlu0 %v4518_v19, %s2538_s27  ;;  %v1480_v1 = vsel %vm1464_vm5, %v1447_v27, %v884_v55 }
 0x1d6   : > { %v1513_v19 = vsel %vm1497_vm6, %v1480_v1, %v989_v22 }
 0x1d7   : > { %v888_v26 = vpop.permute.xlu1 %887  ;;  %v1298_v59 = vpop.permute.xlu0 %1297  ;;  %v1546_v12 = vsel %vm1530_vm7, %v1513_v19, %v1089_v4 }
 0x1d8   : > { %v1611_v24 = vsel %vm1596_vm9, %v1578_v43, %v1298_v59  ;;  %v1579_v10 = vsel %vm1563_vm8, %v1546_v12, %v1195_v37  ;;  %v1482_v22 = vsel %vm1464_vm5, %v1449_v34, %v888_v26  ;;  %v353_v43 = vld [vmem:[%s3990_s15 + $0x10] sm:$0xff] }
 0x1d9   : > { %1012 = vrot.lane.b32.xlu1 %v4519_v42, %s2539_s30  ;;  %1319 = vrot.lane.b32.xlu0 %v3935_v11, %s2542_s10  ;;  %v3964_v42 = vsel %vm405_vm0, %v847_v38, %v849_v62  ;;  %v4003_v38 = vstv %s358_s8 }
 0x1da   : > { %2374 = vmatprep.mubr.msk.f32.mxu0 %vm1629_vm10, %v1611_v24  ;;  %v361_v35 = vmul.f32 %v4003_v38, %v352_v58  ;;  %v4033_v59 = vmul.f32 %v4003_v38, %v353_v43 }
 0x1db   : > { %v1300_v57 = vpop.permute.xlu1 %1299  ;;  %v991_v44 = vpop.permute.xlu0 %990 }
 0x1dc   : > { %v1612_v46 = vsel %vm1596_vm9, %v1579_v10, %v1300_v57  ;;  %v1156_v45 = vrot.slane %v361_v35, 1  ;;  %v1261_v19 = vrot.slane %v361_v35, 2  ;;  %v1158_v12 = vrot.slane %v4033_v59, 1 }
 0x1dd   : > { %803 = vrot.lane.b32.xlu1 %v3868_v52, %s2537_s14  ;;  %1110 = vrot.lane.b32.xlu0 %v3899_v63, %s2540_s12  ;;  %v954_v52 = vrot.slane %v3942_v39, 2 }
 0x1de   : > { %2375 = vmatmul.mubr.msk.f32.gmra.mxu0 %vm1629_vm10, %v1612_v46 }
 0x1df   : > { %v1091_v14 = vpop.permute.xlu1 %1090  ;;  %v993_v30 = vpop.permute.xlu0 %992  ;;  %v3980_v49 = vsel %vm574_vm1, %v952_v3, %v954_v52  ;;  %v4016_v60 = vsel %vm574_vm1, %v954_v52, %v956_v36  ;;  %v360_v3 = vmul.f32 %v4003_v38, %v351_v48 }
 0x1e0   : > { %v1515_v4 = vsel %vm1497_vm6, %v1482_v22, %v993_v30  ;;  %v1159_v30 = vsel %vm405_vm0, %v1156_v45, %v1158_v12 }
 0x1e1   : > { %1216 = vrot.lane.b32.xlu1 %v3964_v42, %s2541_s16  ;;  %1112 = vrot.lane.b32.xlu0 %v3942_v39, %s2540_s12  ;;  %v1260_v24 = vrot.slane %v360_v3, 2 }
 0x1e3   : > { %v1197_v55 = vpop.permute.xlu1 %1196  ;;  %v1093_v47 = vpop.permute.xlu0 %1092 }
 0x1e4   : > { %v1548_v33 = vsel %vm1530_vm7, %v1515_v4, %v1093_v47 }
 0x1e5   : > { %909 = vrot.lane.b32.xlu1 %v3895_v6, %s2538_s27  ;;  %805 = vrot.lane.b32.xlu0 %v3871_v13, %s2537_s14  ;;  %v1514_v13 = vsel %vm1497_vm6, %v1481_v8, %v991_v44 }
 0x1e6   : > { %v1547_v6 = vsel %vm1530_vm7, %v1514_v13, %v1091_v14  ;;  %v1262_v14 = vsel %vm574_vm1, %v1260_v24, %v1261_v19 }
 0x1e7   : > { %v1199_v41 = vpop.permute.xlu1 %1198  ;;  %v890_v51 = vpop.permute.xlu0 %889  ;;  %v1580_v40 = vsel %vm1563_vm8, %v1547_v6, %v1197_v55 }
 0x1e8   : > { %v1581_v37 = vsel %vm1563_vm8, %v1548_v33, %v1199_v41  ;;  %v354_v41 = vld [vmem:[%s3990_s15 + $0x18] sm:$0xff] }
 0x1e9   : > { %1321 = vrot.lane.b32.xlu1 %v3980_v49, %s2542_s10  ;;  %1218 = vrot.lane.b32.xlu0 %v3983_v53, %s2541_s16  ;;  %v363_v6 = vmul.f32 %v4003_v38, %v354_v41 }
 0x1eb   : > { %v892_v7 = vpop.permute.xlu1 %891  ;;  %v1302_v61 = vpop.permute.xlu0 %1301  ;;  %v1265_v58 = vrot.slane %v363_v6, 2 }
 0x1ec   : > { %v1613_v0 = vsel %vm1596_vm9, %v1580_v40, %v1302_v61 }
 0x1ed   : > { %1014 = vrot.lane.b32.xlu1 %v3914_v16, %s2539_s30  ;;  %911 = vrot.lane.b32.xlu0 %v3917_v20, %s2538_s27  ;;  %v1155_v20 = vrot.slane %v360_v3, 1 }
 0x1ee   : > { %2377 = vmatprep.mubr.msk.f32.mxu1 %vm1629_vm10, %v1613_v0  ;;  %v1452_v0 = vsel %vm1431_vm4, %v3419_v32, %v3587_v21 }
 0x1ef   : > { %v1304_v56 = vpop.permute.xlu1 %1303  ;;  %v995_v9 = vpop.permute.xlu0 %994  ;;  %v1157_v26 = vsel %vm405_vm0, %v1155_v20, %v1156_v45 }
 0x1f0   : > { %v1614_v16 = vsel %vm1596_vm9, %v1581_v37, %v1304_v56 }
 0x1f1   : > { %1016 = vrot.lane.b32.xlu1 %v3935_v11, %s2539_s30  ;;  %1323 = vrot.lane.b32.xlu0 %v4016_v60, %s2542_s10 }
 0x1f2   : > { %2378 = vmatmul.mubr.msk.f32.vlgmr.msra.gmra.mxu1 %vm1629_vm10, %v1614_v16 }
 0x1f3   : > { %v1095_v28 = vpop.permute.xlu1 %1094  ;;  %v997_v27 = vpop.permute.xlu0 %996 }
 0x1f5   : > { %807 = vrot.lane.b32.xlu1 %v3899_v63, %s2537_s14  ;;  %1114 = vrot.lane.b32.xlu0 %v360_v3, %s2540_s12  ;;  %v1450_v63 = vsel %vm1431_vm4, %v3403_v23, %v3579_v29  ;;  %v1451_v23 = vsel %vm1431_vm4, %v3400_v15, %v3577_v17  ;;  %v1263_v17 = vrot.slane %v4033_v59, 2  ;;  %v4100_v3 = vld [vmem:[%s4299_s2] ss:$0 sm:$0xff] }
 0x1f6   : > { %v1483_v57 = vsel %vm1464_vm5, %v1450_v63, %v890_v51  ;;  %v355_v51 = vld [vmem:[%s3990_s15 + $0x20] sm:$0x3] }
 0x1f7   : > { %v1201_v11 = vpop.permute.xlu1 %1200  ;;  %v1097_v1 = vpop.permute.xlu0 %1096  ;;  %v1516_v44 = vsel %vm1497_vm6, %v1483_v57, %v995_v9  ;;  %v1264_v13 = vsel %vm574_vm1, %v1261_v19, %v1263_v17  ;;  %v364_v36 = vmul.f32 %v4003_v38, %v355_v51  ;;  %v1266_v56 = vsel %vm574_vm1, %v1263_v17, %v1265_v58 }
 0x1f8   : > { %v1549_v46 = vsel %vm1530_vm7, %v1516_v44, %v1095_v28 }
 0x1f9   : > { %1220 = vrot.lane.b32.xlu1 %v1157_v26, %s2541_s16  ;;  %1116 = vrot.lane.b32.xlu0 %v361_v35, %s2540_s12  ;;  %v1582_v29 = vsel %vm1563_vm8, %v1549_v46, %v1201_v11  ;;  %v1267_v22 = vrot.slane %v364_v36, 2  ;;  %v1453_v26 = vsel %vm1431_vm4, %v3416_v18, %v3585_v31 }
 0x1fb   : > { %v1203_v62 = vpop.permute.xlu1 %1202  ;;  %v894_v10 = vpop.permute.xlu0 %893  ;;  %v1268_v37 = vsel %vm574_vm1, %v1265_v58, %v1267_v22 }
 0x1fd   : > { %913 = vrot.lane.b32.xlu1 %v3964_v42, %s2538_s27  ;;  %809 = vrot.lane.b32.xlu0 %v3942_v39, %s2537_s14  ;;  %v1484_v39 = vsel %vm1464_vm5, %v1451_v23, %v892_v7  ;;  %s2231_s14 = sshll.u32 %s4540_s19, 7  ;;  %v1162_v7 = vrot.slane %v364_v36, 1 }
 0x1fe   : > { %v1517_v25 = vsel %vm1497_vm6, %v1484_v39, %v997_v27 }
 0x1ff   : > { %v4054_v50 = vpop.permute.xlu1 %895  ;;  %v1306_v42 = vpop.permute.xlu0 %1305  ;;  %v1550_v15 = vsel %vm1530_vm7, %v1517_v25, %v1097_v1 }
 0x200   : > { %v1615_v52 = vsel %vm1596_vm9, %v1582_v29, %v1306_v42  ;;  %v1583_v55 = vsel %vm1563_vm8, %v1550_v15, %v1203_v62 }
 0x201   : > { %1325 = vrot.lane.b32.xlu1 %v1262_v14, %s2542_s10  ;;  %1222 = vrot.lane.b32.xlu0 %v1159_v30, %s2541_s16 }
 0x202   : > { %2380 = vmatprep.mubr.msk.f32.mxu1 %vm1629_vm10, %v1615_v52 }
 0x203   : > { %v1308_v47 = vpop.permute.xlu1 %1307  ;;  %v999_v54 = vpop.permute.xlu0 %998 }
 0x204   : > { %v1616_v8 = vsel %vm1596_vm9, %v1583_v55, %v1308_v47 }
 0x205   : > { %1018 = vrot.lane.b32.xlu1 %v3980_v49, %s2539_s30  ;;  %915 = vrot.lane.b32.xlu0 %v3983_v53, %s2538_s27  ;;  %v1160_v49 = vrot.slane %v363_v6, 1  ;;  %s267_s27 = sadd.s32 %s2231_s14, %s2230_s7 }
 0x206   : > { %2381 = vmatmul.mubr.msk.f32.gmra.mxu1 %vm1629_vm10, %v1616_v8 }
 0x207   : > { %v1099_v34 = vpop.permute.xlu1 %1098  ;;  %v1001_v40 = vpop.permute.xlu0 %1000  ;;  %v1163_v48 = vsel %vm405_vm0, %v1160_v49, %v1162_v7  ;;  %v1161_v38 = vsel %vm405_vm0, %v1158_v12, %v1160_v49  ;;  %v1486_v12 = vsel %vm1464_vm5, %v1453_v26, %v4054_v50  ;;  %v1454_v50 = vsel %vm1431_vm4, %v3435_v2, %v3593_v5 }
 0x208   : > { %v1519_v63 = vsel %vm1497_vm6, %v1486_v12, %v1001_v40 }
 0x209   : > { %1020 = vrot.lane.b32.xlu1 %v4016_v60, %s2539_s30  ;;  %1327 = vrot.lane.b32.xlu0 %v1264_v13, %s2542_s10  ;;  %s2232_s30 = sshll.u32 %s267_s27, 3  ;;  %v1485_v60 = vsel %vm1464_vm5, %v1452_v0, %v894_v10 }
 0x20a   : > { %v1518_v35 = vsel %vm1497_vm6, %v1485_v60, %v999_v54  ;;  %s4108_s29 = scalar_lea.vmem %s4300_s3, %s2232_s30 }
 0x20b   : > { %v1205_v53 = vpop.permute.xlu1 %1204  ;;  %v1101_v61 = vpop.permute.xlu0 %1100  ;;  %v1551_v32 = vsel %vm1530_vm7, %v1518_v35, %v1099_v34  ;;  %v4520_v34 = vld [vmem:[#allocation64_spill] sm:$0xff] }
 0x20c   : > { %v1584_v9 = vsel %vm1563_vm8, %v1551_v32, %v1205_v53  ;;  %v1552_v10 = vsel %vm1530_vm7, %v1519_v63, %v1101_v61 }
 0x20d   : > { %1120 = vrot.lane.b32.xlu1 %v363_v6, %s2540_s12  ;;  %1118 = vrot.lane.b32.xlu0 %v4033_v59, %s2540_s12 }
 0x20f   : > { %v898_v4 = vpop.permute.xlu1 %897  ;;  %v4094_v33 = vpop.permute.xlu0 %793 }
 0x210   : > { %v1487_v25 = vsel %vm1464_vm5, %v1454_v50, %v898_v4  ;;  %v1455_v40 = vsel %vm1431_vm4, %v4520_v34, %v4094_v33 }
 0x211   : > { %1226 = vrot.lane.b32.xlu1 %v1163_v48, %s2541_s16  ;;  %1224 = vrot.lane.b32.xlu0 %v1161_v38, %s2541_s16  ;;  %s2233_s16 = sshll.u32 %s4540_s19, 2 }
 0x212   : > { %v2355_v21 = vpop.f32.mrf.mxu0  ;;  %s275_s6 = sadd.s32 %s2233_s16, %s4546_s18 }
 0x213   : > { %v1757_v16 = vadd.f32 %v2355_v21, %v4100_v3  ;;  %v1310_v20 = vpop.permute.xlu1 %1309  ;;  %v1207_v45 = vpop.permute.xlu0 %1206  ;;  %s276_s11 = scalar_lea.vmem %s4301_s4, %s275_s6  ;;  %s283_s8 = scalar_lea.vmem %s4302_s5, %s275_s6 }
 0x214   : > { %v1617_v28 = vsel %vm1596_vm9, %v1584_v9, %v1310_v20  ;;  %v1751_v27 = vpop.f32.mrf.mxu0  ;;  %v1585_v57 = vsel %vm1563_vm8, %v1552_v10, %v1207_v45 }
 0x215   : > { %1911 = vst [vmem:[%s4108_s29 + $0x8] sm:$0xff] %v1757_v16  ;;  %v1752_v43 = vadd.f32 %v4100_v3, %v1751_v27  ;;  %1331 = vrot.lane.b32.xlu1 %v1268_v37, %s2542_s10  ;;  %1329 = vrot.lane.b32.xlu0 %v1266_v56, %s2542_s10  ;;  %v1981_v59 = vmul.f32 %v1757_v16, %v1757_v16 }
 0x216   : > { %2383 = vmatprep.mubr.msk.f32.mxu1 %vm1629_vm10, %v1617_v28 }
 0x217   : > { %1910 = vst [vmem:[%s4108_s29] sm:$0xff] %v1752_v43  ;;  %v1942_v11 = vadd.f32 %v1757_v16, %v1752_v43  ;;  %v1980_v1 = vmul.f32 %v1752_v43, %v1752_v43  ;;  %v1003_v24 = vpop.permute.xlu1 %1002  ;;  %v900_v19 = vpop.permute.xlu0 %899  ;;  %v4521_v16 = vld [vmem:[#allocation66_spill] sm:$0xff] }
 0x218   : > { %v1520_v17 = vsel %vm1497_vm6, %v1487_v25, %v1003_v24  ;;  %v1488_v61 = vsel %vm1464_vm5, %v1455_v40, %v900_v19 }
 0x219   : > { %v2012_v62 = vadd.f32 %v1981_v59, %v1980_v1 }
 0x21b   : > { %v1005_v44 = vpop.permute.xlu1 %1004  ;;  %v1312_v46 = vpop.permute.xlu0 %1311 }
 0x21c   : > { %v1618_v18 = vsel %vm1596_vm9, %v1585_v57, %v1312_v46  ;;  %v1521_v48 = vsel %vm1497_vm6, %v1488_v61, %v1005_v44  ;;  %v4522_v44 = vld [vmem:[#allocation65_spill] sm:$0xff] }
 0x21d   : > { %2384 = vmatmul.mubr.msk.f32.gmra.mxu1 %vm1629_vm10, %v1618_v18 }
 0x21f   : > { %v796_v31 = vpop.permute.xlu1 %795  ;;  %v1103_v14 = vpop.permute.xlu0 %1102 }
 0x220   : > { %v1553_v47 = vsel %vm1530_vm7, %v1520_v17, %v1103_v14  ;;  %v1456_v20 = vsel %vm1431_vm4, %v4521_v16, %v796_v31 }
 0x223   : > { %v1209_v30 = vpop.permute.xlu1 %1208  ;;  %v1105_v23 = vpop.permute.xlu0 %1104 }
 0x224   : > { %v1586_v54 = vsel %vm1563_vm8, %v1553_v47, %v1209_v30  ;;  %v1554_v38 = vsel %vm1530_vm7, %v1521_v48, %v1105_v23 }
 0x226   : > { %v2358_v29 = vpop.f32.mrf.mxu0 }
 0x227   : > { %v1767_v42 = vadd.f32 %v2358_v29, %v4100_v3  ;;  %v902_v39 = vpop.permute.xlu1 %901  ;;  %v798_v52 = vpop.permute.xlu0 %797 }
 0x228   : > { %v1761_v15 = vpop.f32.mrf.mxu0  ;;  %v1489_v26 = vsel %vm1464_vm5, %v1456_v20, %v902_v39  ;;  %v1457_v46 = vsel %vm1431_vm4, %v4522_v44, %v798_v52 }
 0x229   : > { %1913 = vst [vmem:[%s4108_s29 + $0x18] sm:$0xff] %v1767_v42  ;;  %v1762_v55 = vadd.f32 %v4100_v3, %v1761_v15  ;;  %v1983_v13 = vmul.f32 %v1767_v42, %v1767_v42 }
 0x22b   : > { %1912 = vst [vmem:[%s4108_s29 + $0x10] sm:$0xff] %v1762_v55  ;;  %v1943_v41 = vadd.f32 %v1942_v11, %v1762_v55  ;;  %v1982_v51 = vmul.f32 %v1762_v55, %v1762_v55  ;;  %v1314_v2 = vpop.permute.xlu1 %1313  ;;  %v1211_v5 = vpop.permute.xlu0 %1210 }
 0x22c   : > { %v1619_v8 = vsel %vm1596_vm9, %v1586_v54, %v1314_v2  ;;  %v1587_v58 = vsel %vm1563_vm8, %v1554_v38, %v1211_v5 }
 0x22d   : > { %v2013_v6 = vadd.f32 %v2012_v62, %v1982_v51  ;;  %2386 = vmatprep.mubr.msk.f32.mxu1 %vm1629_vm10, %v1619_v8  ;;  %v1944_v36 = vadd.f32 %v1943_v41, %v1767_v42 }
 0x22f   : > { %v1007_v49 = vpop.permute.xlu1 %1006  ;;  %v904_v7 = vpop.permute.xlu0 %903  ;;  %v2014_v53 = vadd.f32 %v2013_v6, %v1983_v13  ;;  %v4523_v6 = vld [vmem:[#allocation67_spill] sm:$0xff] }
 0x230   : > { %v1522_v59 = vsel %vm1497_vm6, %v1489_v26, %v1007_v49  ;;  %v1490_v14 = vsel %vm1464_vm5, %v1457_v46, %v904_v7 }
 0x233   : > { %v1009_v22 = vpop.permute.xlu1 %1008  ;;  %v1316_v0 = vpop.permute.xlu0 %1315 }
 0x234   : > { %v1620_v4 = vsel %vm1596_vm9, %v1587_v58, %v1316_v0  ;;  %v1523_v30 = vsel %vm1497_vm6, %v1490_v14, %v1009_v22  ;;  %v4524_v0 = vld [vmem:[#allocation55_spill] sm:$0xff] }
 0x235   : > { %2387 = vmatmul.mubr.msk.f32.gmra.mxu1 %vm1629_vm10, %v1620_v4 }
 0x237   : > { %v800_v33 = vpop.permute.xlu1 %799  ;;  %v1107_v60 = vpop.permute.xlu0 %1106 }
 0x238   : > { %v1555_v19 = vsel %vm1530_vm7, %v1522_v59, %v1107_v60 }
 0x23a   : > { %v2361_v35 = vpop.f32.mrf.mxu0 }
 0x23b   : > { %v1777_v32 = vadd.f32 %v2361_v35, %v4100_v3  ;;  %v1213_v21 = vpop.permute.xlu1 %1212  ;;  %v1109_v37 = vpop.permute.xlu0 %1108 }
 0x23c   : > { %v1771_v56 = vpop.f32.mrf.mxu0  ;;  %v1588_v12 = vsel %vm1563_vm8, %v1555_v19, %v1213_v21  ;;  %v1556_v23 = vsel %vm1530_vm7, %v1523_v30, %v1109_v37 }
 0x23d   : > { %1915 = vst [vmem:[%s4108_s29 + $0x28] sm:$0xff] %v1777_v32  ;;  %v1772_v9 = vadd.f32 %v4100_v3, %v1771_v56  ;;  %v1985_v11 = vmul.f32 %v1777_v32, %v1777_v32 }
 0x23f   : > { %1914 = vst [vmem:[%s4108_s29 + $0x20] sm:$0xff] %v1772_v9  ;;  %v1945_v45 = vadd.f32 %v1944_v36, %v1772_v9  ;;  %v1984_v28 = vmul.f32 %v1772_v9, %v1772_v9  ;;  %v906_v27 = vpop.permute.xlu1 %905  ;;  %v802_v43 = vpop.permute.xlu0 %801  ;;  %v1458_v36 = vsel %vm1431_vm4, %v4523_v6, %v800_v33 }
 0x240   : > { %v1491_v7 = vsel %vm1464_vm5, %v1458_v36, %v906_v27  ;;  %v1459_v4 = vsel %vm1431_vm4, %v4524_v0, %v802_v43 }
 0x241   : > { %v2015_v1 = vadd.f32 %v2014_v53, %v1984_v28  ;;  %v1946_v24 = vadd.f32 %v1945_v45, %v1777_v32 }
 0x243   : > { %v1318_v63 = vpop.permute.xlu1 %1317  ;;  %v1215_v62 = vpop.permute.xlu0 %1214  ;;  %v2016_v10 = vadd.f32 %v2015_v1, %v1985_v11 }
 0x244   : > { %v1621_v57 = vsel %vm1596_vm9, %v1588_v12, %v1318_v63  ;;  %v1589_v29 = vsel %vm1563_vm8, %v1556_v23, %v1215_v62 }
 0x245   : > { %2389 = vmatprep.mubr.msk.f32.mxu1 %vm1629_vm10, %v1621_v57 }
 0x247   : > { %v1011_v18 = vpop.permute.xlu1 %1010  ;;  %v908_v31 = vpop.permute.xlu0 %907 }
 0x248   : > { %v1524_v53 = vsel %vm1497_vm6, %v1491_v7, %v1011_v18  ;;  %v1492_v35 = vsel %vm1464_vm5, %v1459_v4, %v908_v31 }
 0x24b   : > { %v1013_v50 = vpop.permute.xlu1 %1012  ;;  %v1320_v42 = vpop.permute.xlu0 %1319 }
 0x24c   : > { %v1622_v39 = vsel %vm1596_vm9, %v1589_v29, %v1320_v42  ;;  %v1525_v32 = vsel %vm1497_vm6, %v1492_v35, %v1013_v50 }
 0x24d   : > { %2390 = vmatmul.mubr.msk.f32.gmra.mxu1 %vm1629_vm10, %v1622_v39  ;;  %v4526_v39 = vld [vmem:[#allocation29_spill] sm:$0xff] }
 0x24e   : > { %v2364_v25 = vpop.f32.mrf.mxu0 }
 0x24f   : > { %v1787_v52 = vadd.f32 %v2364_v25, %v4100_v3  ;;  %v804_v15 = vpop.permute.xlu1 %803  ;;  %v1111_v17 = vpop.permute.xlu0 %1110 }
 0x250   : > { %v1781_v55 = vpop.f32.mrf.mxu0  ;;  %v1557_v61 = vsel %vm1530_vm7, %v1524_v53, %v1111_v17 }
 0x251   : > { %1917 = vst [vmem:[%s4108_s29 + $0x38] sm:$0xff] %v1787_v52  ;;  %v1782_v47 = vadd.f32 %v4100_v3, %v1781_v55  ;;  %v1987_v5 = vmul.f32 %v1787_v52, %v1787_v52 }
 0x253   : > { %1916 = vst [vmem:[%s4108_s29 + $0x30] sm:$0xff] %v1782_v47  ;;  %v1947_v54 = vadd.f32 %v1946_v24, %v1782_v47  ;;  %v1986_v41 = vmul.f32 %v1782_v47, %v1782_v47  ;;  %v1217_v51 = vpop.permute.xlu1 %1216  ;;  %v1113_v2 = vpop.permute.xlu0 %1112 }
 0x254   : > { %v1590_v48 = vsel %vm1563_vm8, %v1557_v61, %v1217_v51  ;;  %v1558_v21 = vsel %vm1530_vm7, %v1525_v32, %v1113_v2 }
 0x255   : > { %v2017_v8 = vadd.f32 %v2016_v10, %v1986_v41  ;;  %v1948_v13 = vadd.f32 %v1947_v54, %v1787_v52  ;;  %v4525_v10 = vld [vmem:[#allocation56_spill] sm:$0xff] }
 0x256   : > { %v1460_v57 = vsel %vm1431_vm4, %v4525_v10, %v804_v15 }
 0x257   : > { %v910_v34 = vpop.permute.xlu1 %909  ;;  %v806_v40 = vpop.permute.xlu0 %805  ;;  %v2018_v49 = vadd.f32 %v2017_v8, %v1987_v5 }
 0x258   : > { %v1493_v18 = vsel %vm1464_vm5, %v1460_v57, %v910_v34  ;;  %v1461_v25 = vsel %vm1431_vm4, %v4526_v39, %v806_v40 }
 0x25b   : > { %v1322_v38 = vpop.permute.xlu1 %1321  ;;  %v1219_v58 = vpop.permute.xlu0 %1218 }
 0x25c   : > { %v1623_v22 = vsel %vm1596_vm9, %v1590_v48, %v1322_v38  ;;  %v1591_v56 = vsel %vm1563_vm8, %v1558_v21, %v1219_v58  ;;  %v4527_v48 = vld [vmem:[#allocation57_spill] sm:$0xff]  ;;  %v4528_v58 = vld [vmem:[#allocation18_spill] sm:$0xff] }
 0x25d   : > { %2392 = vmatprep.mubr.msk.f32.mxu1 %vm1629_vm10, %v1623_v22 }
 0x25f   : > { %v1015_v33 = vpop.permute.xlu1 %1014  ;;  %v912_v60 = vpop.permute.xlu0 %911 }
 0x260   : > { %v1526_v31 = vsel %vm1497_vm6, %v1493_v18, %v1015_v33  ;;  %v1494_v55 = vsel %vm1464_vm5, %v1461_v25, %v912_v60 }
 0x262   : > { %v2367_v37 = vpop.f32.mrf.mxu0 }
 0x263   : > { %v1797_v9 = vadd.f32 %v2367_v37, %v4100_v3  ;;  %v1017_v16 = vpop.permute.xlu1 %1016  ;;  %v1324_v20 = vpop.permute.xlu0 %1323 }
 0x264   : > { %v1791_v45 = vpop.f32.mrf.mxu0  ;;  %v1624_v28 = vsel %vm1596_vm9, %v1591_v56, %v1324_v20  ;;  %v1527_v54 = vsel %vm1497_vm6, %v1494_v55, %v1017_v16 }
 0x265   : > { %1919 = vst [vmem:[%s4108_s29 + $0x48] sm:$0xff] %v1797_v9  ;;  %v1792_v27 = vadd.f32 %v4100_v3, %v1791_v45  ;;  %2393 = vmatmul.mubr.msk.f32.gmra.mxu1 %vm1629_vm10, %v1624_v28  ;;  %v1989_v1 = vmul.f32 %v1797_v9, %v1797_v9 }
 0x267   : > { %1918 = vst [vmem:[%s4108_s29 + $0x40] sm:$0xff] %v1792_v27  ;;  %v1949_v43 = vadd.f32 %v1948_v13, %v1792_v27  ;;  %v1988_v26 = vmul.f32 %v1792_v27, %v1792_v27  ;;  %v808_v59 = vpop.permute.xlu1 %807  ;;  %v1115_v11 = vpop.permute.xlu0 %1114 }
 0x268   : > { %v1559_v14 = vsel %vm1530_vm7, %v1526_v31, %v1115_v11  ;;  %v1462_v38 = vsel %vm1431_vm4, %v4527_v48, %v808_v59 }
 0x269   : > { %v2019_v24 = vadd.f32 %v2018_v49, %v1988_v26  ;;  %v1950_v19 = vadd.f32 %v1949_v43, %v1797_v9 }
 0x26b   : > { %v1221_v12 = vpop.permute.xlu1 %1220  ;;  %v1117_v63 = vpop.permute.xlu0 %1116  ;;  %v2020_v62 = vadd.f32 %v2019_v24, %v1989_v1 }
 0x26c   : > { %v1592_v30 = vsel %vm1563_vm8, %v1559_v14, %v1221_v12  ;;  %v1560_v51 = vsel %vm1530_vm7, %v1527_v54, %v1117_v63 }
 0x26f   : > { %v914_v44 = vpop.permute.xlu1 %913  ;;  %v810_v46 = vpop.permute.xlu0 %809 }
 0x270   : > { %v1463_v22 = vsel %vm1431_vm4, %v4528_v58, %v810_v46  ;;  %v1495_v33 = vsel %vm1464_vm5, %v1462_v38, %v914_v44 }
 0x273   : > { %v1326_v23 = vpop.permute.xlu1 %1325  ;;  %v1223_v29 = vpop.permute.xlu0 %1222 }
 0x274   : > { %v1625_v50 = vsel %vm1596_vm9, %v1592_v30, %v1326_v23  ;;  %v1593_v2 = vsel %vm1563_vm8, %v1560_v51, %v1223_v29 }
 0x275   : > { %2395 = vmatprep.mubr.msk.f32.mxu1 %vm1629_vm10, %v1625_v50 }
 0x276   : > { %v2370_v42 = vpop.f32.mrf.mxu0 }
 0x277   : > { %v1807_v52 = vadd.f32 %v2370_v42, %v4100_v3  ;;  %v1019_v15 = vpop.permute.xlu1 %1018  ;;  %v916_v17 = vpop.permute.xlu0 %915 }
 0x278   : > { %v1801_v47 = vpop.f32.mrf.mxu0  ;;  %v1496_v60 = vsel %vm1464_vm5, %v1463_v22, %v916_v17  ;;  %v1528_v35 = vsel %vm1497_vm6, %v1495_v33, %v1019_v15 }
 0x279   : > { %1921 = vst [vmem:[%s4108_s29 + $0x58] sm:$0xff] %v1807_v52  ;;  %v1802_v41 = vadd.f32 %v4100_v3, %v1801_v47  ;;  %v1991_v34 = vmul.f32 %v1807_v52, %v1807_v52 }
 0x27b   : > { %1920 = vst [vmem:[%s4108_s29 + $0x50] sm:$0xff] %v1802_v41  ;;  %v1951_v5 = vadd.f32 %v1950_v19, %v1802_v41  ;;  %v1990_v8 = vmul.f32 %v1802_v41, %v1802_v41  ;;  %v1021_v13 = vpop.permute.xlu1 %1020  ;;  %v1328_v6 = vpop.permute.xlu0 %1327 }
 0x27c   : > { %v1626_v36 = vsel %vm1596_vm9, %v1593_v2, %v1328_v6  ;;  %v1529_v32 = vsel %vm1497_vm6, %v1496_v60, %v1021_v13 }
 0x27d   : > { %v2021_v40 = vadd.f32 %v2020_v62, %v1990_v8  ;;  %2396 = vmatmul.mubr.msk.f32.gmra.mxu1 %vm1629_vm10, %v1626_v36  ;;  %v1952_v49 = vadd.f32 %v1951_v5, %v1807_v52 }
 0x27f   : > { %v1121_v7 = vpop.permute.xlu1 %1120  ;;  %v1119_v53 = vpop.permute.xlu0 %1118  ;;  %v2022_v61 = vadd.f32 %v2021_v40, %v1991_v34 }
 0x280   : > { %v1562_v21 = vsel %vm1530_vm7, %v1529_v32, %v1121_v7  ;;  %v1561_v37 = vsel %vm1530_vm7, %v1528_v35, %v1119_v53 }
 0x283   : > { %v1227_v0 = vpop.permute.xlu1 %1226  ;;  %v1225_v4 = vpop.permute.xlu0 %1224 }
 0x284   : > { %v1595_v56 = vsel %vm1563_vm8, %v1562_v21, %v1227_v0  ;;  %v1594_v9 = vsel %vm1563_vm8, %v1561_v37, %v1225_v4 }
 0x287   : > { %v1332_v16 = vpop.permute.xlu1 %1331  ;;  %v1330_v20 = vpop.permute.xlu0 %1329 }
 0x288   : > { %v1628_v45 = vsel %vm1596_vm9, %v1595_v56, %v1332_v16  ;;  %v1627_v28 = vsel %vm1596_vm9, %v1594_v9, %v1330_v20 }
 0x289   : > { %2398 = vmatprep.mubr.msk.f32.mxu1 %vm1629_vm10, %v1627_v28 }
 0x28a   : > { %v2373_v27 = vpop.f32.mrf.mxu0  ;;  %2399 = vmatmul.mubr.msk.f32.gmra.mxu1 %vm1629_vm10, %v1628_v45 }
 0x28b   : > { %v1817_v43 = vadd.f32 %v2373_v27, %v4100_v3 }
 0x28c   : > { %v1811_v26 = vpop.f32.mrf.mxu0 }
 0x28d   : > { %1923 = vst [vmem:[%s4108_s29 + $0x68] sm:$0xff] %v1817_v43  ;;  %v1812_v59 = vadd.f32 %v4100_v3, %v1811_v26  ;;  %v1993_v24 = vmul.f32 %v1817_v43, %v1817_v43 }
 0x28f   : > { %1922 = vst [vmem:[%s4108_s29 + $0x60] sm:$0xff] %v1812_v59  ;;  %v1953_v11 = vadd.f32 %v1952_v49, %v1812_v59  ;;  %v1992_v1 = vmul.f32 %v1812_v59, %v1812_v59 }
 0x291   : > { %v2023_v19 = vadd.f32 %v2022_v61, %v1992_v1  ;;  %v1954_v12 = vadd.f32 %v1953_v11, %v1817_v43 }
 0x293   : > { %v2024_v63 = vadd.f32 %v2023_v19, %v1993_v24 }
 0x29e   : > { %v2376_v62 = vpop.f32.mrf.mxu0 }
 0x29f   : > { %v1827_v10 = vadd.f32 %v2376_v62, %v4100_v3 }
 0x2a0   : > { %v1821_v57 = vpop.f32.mrf.mxu0 }
 0x2a1   : > { %1925 = vst [vmem:[%s4108_s29 + $0x78] sm:$0xff] %v1827_v10  ;;  %v1822_v44 = vadd.f32 %v4100_v3, %v1821_v57  ;;  %v1995_v31 = vmul.f32 %v1827_v10, %v1827_v10 }
 0x2a3   : > { %1924 = vst [vmem:[%s4108_s29 + $0x70] sm:$0xff] %v1822_v44  ;;  %v1955_v46 = vadd.f32 %v1954_v12, %v1822_v44  ;;  %v1994_v18 = vmul.f32 %v1822_v44, %v1822_v44 }
 0x2a5   : > { %v2025_v14 = vadd.f32 %v2024_v63, %v1994_v18  ;;  %v1956_v30 = vadd.f32 %v1955_v46, %v1827_v10 }
 0x2a7   : > { %v2026_v23 = vadd.f32 %v2025_v14, %v1995_v31 }
 0x2b2   : > { %v2379_v29 = vpop.f32.mrf.mxu1 }
 0x2b3   : > { %v1837_v50 = vadd.f32 %v2379_v29, %v4100_v3 }
 0x2b4   : > { %v1831_v42 = vpop.f32.mrf.mxu1 }
 0x2b5   : > { %1927 = vst [vmem:[%s4108_s29 + $0x88] sm:$0xff] %v1837_v50  ;;  %v1832_v39 = vadd.f32 %v4100_v3, %v1831_v42  ;;  %v1997_v15 = vmul.f32 %v1837_v50, %v1837_v50 }
 0x2b7   : > { %1926 = vst [vmem:[%s4108_s29 + $0x80] sm:$0xff] %v1832_v39  ;;  %v1957_v25 = vadd.f32 %v1956_v30, %v1832_v39  ;;  %v1996_v52 = vmul.f32 %v1832_v39, %v1832_v39 }
 0x2b9   : > { %v2027_v17 = vadd.f32 %v2026_v23, %v1996_v52  ;;  %v1958_v55 = vadd.f32 %v1957_v25, %v1837_v50 }
 0x2bb   : > { %v2028_v47 = vadd.f32 %v2027_v17, %v1997_v15 }
 0x2c6   : > { %v2382_v54 = vpop.f32.mrf.mxu1 }
 0x2c7   : > { %v1847_v41 = vadd.f32 %v2382_v54, %v4100_v3 }
 0x2c8   : > { %v1841_v51 = vpop.f32.mrf.mxu1 }
 0x2c9   : > { %1929 = vst [vmem:[%s4108_s29 + $0x98] sm:$0xff] %v1847_v41  ;;  %v1842_v2 = vadd.f32 %v4100_v3, %v1841_v51  ;;  %v1999_v13 = vmul.f32 %v1847_v41, %v1847_v41 }
 0x2cb   : > { %1928 = vst [vmem:[%s4108_s29 + $0x90] sm:$0xff] %v1842_v2  ;;  %v1959_v5 = vadd.f32 %v1958_v55, %v1842_v2  ;;  %v1998_v8 = vmul.f32 %v1842_v2, %v1842_v2 }
 0x2cd   : > { %v2029_v6 = vadd.f32 %v2028_v47, %v1998_v8  ;;  %v1960_v36 = vadd.f32 %v1959_v5, %v1847_v41 }
 0x2cf   : > { %v2030_v34 = vadd.f32 %v2029_v6, %v1999_v13 }
 0x2dd   : > { %v2385_v40 = vpop.f32.mrf.mxu1 }
 0x2de   : > { %v1857_v49 = vadd.f32 %v2385_v40, %v4100_v3 }
 0x2df   : > { %v1851_v7 = vpop.f32.mrf.mxu1 }
 0x2e0   : > { %1931 = vst [vmem:[%s4108_s29 + $0xa8] sm:$0xff] %v1857_v49  ;;  %v1852_v53 = vadd.f32 %v4100_v3, %v1851_v7  ;;  %v2001_v38 = vmul.f32 %v1857_v49, %v1857_v49 }
 0x2e2   : > { %1930 = vst [vmem:[%s4108_s29 + $0xa0] sm:$0xff] %v1852_v53  ;;  %v1961_v61 = vadd.f32 %v1960_v36, %v1852_v53  ;;  %v2000_v48 = vmul.f32 %v1852_v53, %v1852_v53 }
 0x2e4   : > { %v2031_v58 = vadd.f32 %v2030_v34, %v2000_v48  ;;  %v1962_v22 = vadd.f32 %v1961_v61, %v1857_v49 }
 0x2e6   : > { %v2032_v0 = vadd.f32 %v2031_v58, %v2001_v38 }
 0x2f5   : > { %v2388_v4 = vpop.f32.mrf.mxu1 }
 0x2f6   : > { %v1867_v33 = vadd.f32 %v2388_v4, %v4100_v3 }
 0x2f7   : > { %v1861_v60 = vpop.f32.mrf.mxu1 }
 0x2f8   : > { %1933 = vst [vmem:[%s4108_s29 + $0xb8] sm:$0xff] %v1867_v33  ;;  %v1862_v35 = vadd.f32 %v4100_v3, %v1861_v60  ;;  %v2003_v37 = vmul.f32 %v1867_v33, %v1867_v33 }
 0x2fa   : > { %1932 = vst [vmem:[%s4108_s29 + $0xb0] sm:$0xff] %v1862_v35  ;;  %v1963_v32 = vadd.f32 %v1962_v22, %v1862_v35  ;;  %v2002_v21 = vmul.f32 %v1862_v35, %v1862_v35 }
 0x2fc   : > { %v2033_v56 = vadd.f32 %v2032_v0, %v2002_v21  ;;  %v1964_v9 = vadd.f32 %v1963_v32, %v1867_v33 }
 0x2fe   : > { %v2034_v16 = vadd.f32 %v2033_v56, %v2003_v37 }
 0x30d   : > { %v2391_v20 = vpop.f32.mrf.mxu1 }
 0x30e   : > { %v1877_v45 = vadd.f32 %v2391_v20, %v4100_v3 }
 0x30f   : > { %v1871_v28 = vpop.f32.mrf.mxu1 }
 0x310   : > { %1935 = vst [vmem:[%s4108_s29 + $0xc8] sm:$0xff] %v1877_v45  ;;  %v1872_v27 = vadd.f32 %v4100_v3, %v1871_v28  ;;  %v2005_v57 = vmul.f32 %v1877_v45, %v1877_v45 }
 0x312   : > { %1934 = vst [vmem:[%s4108_s29 + $0xc0] sm:$0xff] %v1872_v27  ;;  %v2004_v1 = vmul.f32 %v1872_v27, %v1872_v27  ;;  %v1965_v24 = vadd.f32 %v1964_v9, %v1872_v27 }
 0x314   : > { %v2035_v63 = vadd.f32 %v2034_v16, %v2004_v1  ;;  %v1966_v44 = vadd.f32 %v1965_v24, %v1877_v45 }
 0x316   : > { %v2036_v31 = vadd.f32 %v2035_v63, %v2005_v57 }
 0x325   : > { %v2394_v43 = vpop.f32.mrf.mxu1 }
 0x326   : > { %v1887_v26 = vadd.f32 %v2394_v43, %v4100_v3 }
 0x327   : > { %v1881_v59 = vpop.f32.mrf.mxu1 }
 0x328   : > { %1937 = vst [vmem:[%s4108_s29 + $0xd8] sm:$0xff] %v1887_v26  ;;  %v1882_v11 = vadd.f32 %v4100_v3, %v1881_v59  ;;  %v2007_v30 = vmul.f32 %v1887_v26, %v1887_v26 }
 0x32a   : > { %1936 = vst [vmem:[%s4108_s29 + $0xd0] sm:$0xff] %v1882_v11  ;;  %v2006_v46 = vmul.f32 %v1882_v11, %v1882_v11  ;;  %v1967_v18 = vadd.f32 %v1966_v44, %v1882_v11 }
 0x32c   : > { %v2037_v14 = vadd.f32 %v2036_v31, %v2006_v46  ;;  %v1968_v23 = vadd.f32 %v1967_v18, %v1887_v26 }
 0x32e   : > { %v2038_v42 = vadd.f32 %v2037_v14, %v2007_v30 }
 0x33d   : > { %v2397_v19 = vpop.f32.mrf.mxu1 }
 0x33e   : > { %v1897_v12 = vadd.f32 %v2397_v19, %v4100_v3 }
 0x33f   : > { %v1891_v62 = vpop.f32.mrf.mxu1 }
 0x340   : > { %1939 = vst [vmem:[%s4108_s29 + $0xe8] sm:$0xff] %v1897_v12  ;;  %v1892_v10 = vadd.f32 %v4100_v3, %v1891_v62  ;;  %v2009_v17 = vmul.f32 %v1897_v12, %v1897_v12 }
 0x342   : > { %1938 = vst [vmem:[%s4108_s29 + $0xe0] sm:$0xff] %v1892_v10  ;;  %v2008_v29 = vmul.f32 %v1892_v10, %v1892_v10  ;;  %v1969_v50 = vadd.f32 %v1968_v23, %v1892_v10 }
 0x344   : > { %v2039_v25 = vadd.f32 %v2038_v42, %v2008_v29  ;;  %v1970_v47 = vadd.f32 %v1969_v50, %v1897_v12 }
 0x346   : > { %v2040_v51 = vadd.f32 %v2039_v25, %v2009_v17 }
 0x34a   : > { %v2400_v39 = vpop.f32.mrf.mxu1 }
 0x34b   : > { %v1907_v52 = vadd.f32 %v2400_v39, %v4100_v3 }
 0x34c   : > { %v1901_v15 = vpop.f32.mrf.mxu1 }
 0x34d   : > { %1941 = vst [vmem:[%s4108_s29 + $0xf8] sm:$0xff] %v1907_v52  ;;  %v1902_v55 = vadd.f32 %v4100_v3, %v1901_v15  ;;  %v2011_v2 = vmul.f32 %v1907_v52, %v1907_v52 }
 0x34f   : > { %1940 = vst [vmem:[%s4108_s29 + $0xf0] sm:$0xff] %v1902_v55  ;;  %v1971_v54 = vadd.f32 %v1970_v47, %v1902_v55  ;;  %v2010_v41 = vmul.f32 %v1902_v55, %v1902_v55 }
 0x351   : > { %v1972_v5 = vadd.f32 %v1971_v54, %v1907_v52  ;;  %v2041_v8 = vadd.f32 %v2040_v51, %v2010_v41 }
 0x353   : > { %v1973_v13 = vrot.slane %v1972_v5, 4  ;;  %v2042_v6 = vadd.f32 %v2041_v8, %v2011_v2 }
 0x355   : > { %v1974_v36 = vadd.f32 %v1973_v13, %v1972_v5  ;;  %v2043_v34 = vrot.slane %v2042_v6, 4 }
 0x357   : > { %v1975_v40 = vrot.slane %v1974_v36, 2  ;;  %v2044_v49 = vadd.f32 %v2043_v34, %v2042_v6 }
 0x359   : > { %v1976_v7 = vadd.f32 %v1975_v40, %v1974_v36  ;;  %v2045_v53 = vrot.slane %v2044_v49, 2 }
 0x35b   : > { %v1977_v3 = vrot.slane %v1976_v7, 1  ;;  %v2046_v61 = vadd.f32 %v2045_v53, %v2044_v49 }
 0x35d   : > { %v1978_v48 = vadd.f32 %v1977_v3, %v1976_v7  ;;  %v2047_v38 = vrot.slane %v2046_v61, 1 }
 0x35f   : > { %1979 = vst [vmem:[%s276_s11] sm:$0x1] %v1978_v48  ;;  %v2048_v58 = vadd.f32 %v2047_v38, %v2046_v61 }
 0x361   : > { %2049 = vst [vmem:[%s283_s8] sm:$0x1] %v2048_v58 }
 0x362 PF: > { %s16_s22 = sadd.s32 1, %s2533_s22   ;;  %s4529_s18 = smov %s2525_s20 }
 0x363   : > { %p13_p10 = scmp.ge.s32.totalorder %s16_s22, 10   ;;  %s4530_s19 = smov %s2529_s21 }
 0x364   : > { %s4531_s20 = smov %s4534_s23  ;;  %s4532_s21 = smov %s4538_s24 }
 0x365   :  { %15 = sbr.rel (!%p13_p10) target bundleno = 3 (0x3), region = 89 }

// kernel: up_conv_forward.3
= control target key start
LH: loop header
LB: loop body
LE: loop exit
PB: predicated region body
PF: predicated region fallthrough
CT: control target
= control target key end

     0   :  { %s591_s12 = smov 0   ;;  %s593_s13 = smov 0   ;;  %s815_s0 = inlined_call_operand.vmem [shape: f32[2,4,256,128], index: 0, kind: input, shape index: {}, may-alias: {0,3}]   ;;  %s816_s1 = inlined_call_operand.vmem [shape: f32[1,128], index: 1, kind: input, shape index: {}]   ;;  %s817_s2 = inlined_call_operand.vmem [shape: f32[1,128], index: 2, kind: input, shape index: {}]   ;;  %s818_s3 = inlined_call_operand.vmem [shape: f32[2,4,256,128], index: 3, kind: output, shape index: {}, may-alias: {0,3}]  }
   0x1   :  { %s595_s14 = smov 0   ;;  %s597_s15 = smov 0  }
   0x2   :  { %s599_s16 = smov 0  }
   0x3 LB: > { %s22_s17 = sadd.s32 1, %s561_s14  ;;  %s25_s18 = sadd.s32 1, %s565_s15  ;;  %s569_s16 = sphi %s599_s16, %s13_s16   ;;  %s565_s15 = sphi %s597_s15, %s822_s15   ;;  %s561_s14 = sphi %s595_s14, %s821_s14   ;;  %s557_s13 = sphi %s593_s13, %s820_s13   ;;  %s553_s12 = sphi %s591_s12, %s819_s12  }
   0x4   : > { %p23_p0 = scmp.ge.s32.totalorder %s22_s17, 4  ;;  %p480_p1 = scmp.ge.s32.totalorder %s569_s16, 1 }
   0x5   : > { %p157_p2 = scmp.lt.s32.totalorder %s569_s16, 9 }
   0x6   : > { %s824_s17 = smov (%p23_p0, %s22_s17), 0  ;;  %s826_s18 = smov (!%p23_p0, %s25_s18), %s565_s15 }
   0x7   : > { %p158_p3 = pnand %p480_p1, %p157_p2  ;;  %p27_p4 = scmp.ge.s32.totalorder %s826_s18, 2 }
   0x8   : > { %p189_p5 = scmp.lt.s32.totalorder (!%p158_p3), %s557_s13, 1  ;;  %p191_p6 = scmp.lt.s32.totalorder (!%p158_p3), %s553_s12, 3 }
   0x9   : > { %s828_s18 = smov (%p27_p4, %s826_s18), 0  ;;  %161 = sbr.rel (%p158_p3) target bundleno = 49 (0x31), region = 32 }
   0xe   : > { %s830_s13 = smov (!%p189_p5, %s557_s13), 1  ;;  %s832_s12 = smov (!%p191_p6, %s553_s12), 3  ;;  %v627_v0 = vld [vmem:[%s816_s1] ss:$0 sm:$0xff] }
   0xf   : > { %s482_s19 = sshll.u32 %s830_s13, 7  ;;  %s481_s20 = sshll.u32 %s832_s12, 5  ;;  %v639_v1 = vld [vmem:[%s817_s2] ss:$0 sm:$0xff] }
  0x10   : > { %s621_s21 = sadd.s32 %s482_s19, %s481_s20 }
  0x11   : > { %s483_s22 = sshll.u32 %s621_s21, 3 }
  0x12   : > { %s634_s27 = scalar_lea.vmem %s815_s0, %s483_s22  ;;  %s681_s5 = scalar_lea.vmem %s818_s3, %s483_s22 }
  0x13   : > { %v207_v2 = vld [vmem:[%s634_s27] sm:$0xff]  ;;  %v208_v3 = vld [vmem:[%s634_s27 + $0x8] sm:$0xff]  ;;  %v209_v4 = vld [vmem:[%s634_s27 + $0x10] sm:$0xff] }
  0x14   : > { %v210_v5 = vld [vmem:[%s634_s27 + $0x18] sm:$0xff]  ;;  %v211_v6 = vld [vmem:[%s634_s27 + $0x20] sm:$0xff]  ;;  %v212_v7 = vld [vmem:[%s634_s27 + $0x28] sm:$0xff]  ;;  %v246_v8 = vmul.f32 %v627_v0, %v207_v2  ;;  %v247_v9 = vmul.f32 %v627_v0, %v208_v3  ;;  %v248_v10 = vmul.f32 %v627_v0, %v209_v4 }
  0x15   : > { %v213_v11 = vld [vmem:[%s634_s27 + $0x30] sm:$0xff]  ;;  %v214_v12 = vld [vmem:[%s634_s27 + $0x38] sm:$0xff]  ;;  %v249_v13 = vmul.f32 %v627_v0, %v210_v5  ;;  %v250_v14 = vmul.f32 %v627_v0, %v211_v6  ;;  %v251_v15 = vmul.f32 %v627_v0, %v212_v7  ;;  %v215_v20 = vld [vmem:[%s634_s27 + $0x40] sm:$0xff] }
  0x16   : > { %v285_v16 = vadd.f32 %v639_v1, %v246_v8  ;;  %v286_v17 = vadd.f32 %v639_v1, %v247_v9  ;;  %v287_v18 = vadd.f32 %v639_v1, %v248_v10  ;;  %v252_v19 = vmul.f32 %v627_v0, %v213_v11  ;;  %v216_v21 = vld [vmem:[%s634_s27 + $0x48] sm:$0xff]  ;;  %v217_v22 = vld [vmem:[%s634_s27 + $0x50] sm:$0xff]  ;;  %v218_v27 = vld [vmem:[%s634_s27 + $0x58] sm:$0xff] }
  0x17   : > { %v288_v23 = vadd.f32 %v639_v1, %v249_v13  ;;  %v289_v24 = vadd.f32 %v639_v1, %v250_v14  ;;  %v290_v25 = vadd.f32 %v639_v1, %v251_v15  ;;  %v253_v26 = vmul.f32 %v627_v0, %v214_v12  ;;  %v219_v28 = vld [vmem:[%s634_s27 + $0x60] sm:$0xff]  ;;  %v220_v29 = vld [vmem:[%s634_s27 + $0x68] sm:$0xff]  ;;  %v221_v34 = vld [vmem:[%s634_s27 + $0x70] sm:$0xff] }
  0x18   : > { %v317_v30 = vmax.f32 %v285_v16, 0.0  ;;  %v318_v31 = vmax.f32 %v286_v17, 0.0  ;;  %v319_v32 = vmax.f32 %v287_v18, 0.0  ;;  %v291_v33 = vadd.f32 %v639_v1, %v252_v19  ;;  %v222_v39 = vld [vmem:[%s634_s27 + $0x78] sm:$0xff]  ;;  %v223_v44 = vld [vmem:[%s634_s27 + $0x80] sm:$0xff]  ;;  %v224_v45 = vld [vmem:[%s634_s27 + $0x88] sm:$0xff] }
  0x19   : > { %v320_v35 = vmax.f32 %v288_v23, 0.0  ;;  %v321_v36 = vmax.f32 %v289_v24, 0.0  ;;  %v322_v37 = vmax.f32 %v290_v25, 0.0  ;;  %v292_v38 = vadd.f32 %v639_v1, %v253_v26  ;;  %v225_v46 = vld [vmem:[%s634_s27 + $0x90] sm:$0xff]  ;;  %v226_v47 = vld [vmem:[%s634_s27 + $0x98] sm:$0xff]  ;;  %v227_v48 = vld [vmem:[%s634_s27 + $0xa0] sm:$0xff] }
  0x1a   : > { %v323_v40 = vmax.f32 %v291_v33, 0.0  ;;  %v254_v41 = vmul.f32 %v627_v0, %v215_v20  ;;  %v255_v42 = vmul.f32 %v627_v0, %v216_v21  ;;  %v256_v43 = vmul.f32 %v627_v0, %v217_v22  ;;  %v228_v49 = vld [vmem:[%s634_s27 + $0xa8] sm:$0xff]  ;;  %v229_v50 = vld [vmem:[%s634_s27 + $0xb0] sm:$0xff]  ;;  %v230_v51 = vld [vmem:[%s634_s27 + $0xb8] sm:$0xff] }
  0x1b   : > { %v692_v52 = vld [vmem:[%s634_s27 + $0xc0] sm:$0xff]  ;;  %v695_v53 = vld [vmem:[%s634_s27 + $0xc8] sm:$0xff]  ;;  %v324_v54 = vmax.f32 %v292_v38, 0.0  ;;  %v257_v55 = vmul.f32 %v627_v0, %v218_v27  ;;  %v258_v56 = vmul.f32 %v627_v0, %v219_v28  ;;  %v259_v57 = vmul.f32 %v627_v0, %v220_v29  ;;  %v701_v58 = vld [vmem:[%s634_s27 + $0xd0] sm:$0xff] }
  0x1c   : > { %v704_v59 = vld [vmem:[%s634_s27 + $0xd8] sm:$0xff]  ;;  %v707_v60 = vld [vmem:[%s634_s27 + $0xe0] sm:$0xff]  ;;  %v293_v61 = vadd.f32 %v639_v1, %v254_v41  ;;  %v294_v62 = vadd.f32 %v639_v1, %v255_v42  ;;  %v295_v63 = vadd.f32 %v639_v1, %v256_v43  ;;  %v260_v2 = vmul.f32 %v627_v0, %v221_v34  ;;  %v714_v3 = vld [vmem:[%s634_s27 + $0xe8] sm:$0xff] }
  0x1d   : > { %v717_v4 = vld [vmem:[%s634_s27 + $0xf0] sm:$0xff]  ;;  %v720_v5 = vld [vmem:[%s634_s27 + $0xf8] sm:$0xff]  ;;  %v296_v6 = vadd.f32 %v639_v1, %v257_v55  ;;  %v297_v7 = vadd.f32 %v639_v1, %v258_v56  ;;  %v298_v8 = vadd.f32 %v639_v1, %v259_v57  ;;  %v261_v9 = vmul.f32 %v627_v0, %v222_v39 }
  0x1e   : > { %349 = vst [vmem:[%s681_s5] sm:$0xff] %v317_v30  ;;  %350 = vst [vmem:[%s681_s5 + $0x8] sm:$0xff] %v318_v31  ;;  %v325_v10 = vmax.f32 %v293_v61, 0.0  ;;  %v326_v11 = vmax.f32 %v294_v62, 0.0  ;;  %v327_v12 = vmax.f32 %v295_v63, 0.0  ;;  %v299_v13 = vadd.f32 %v639_v1, %v260_v2 }
  0x1f   : > { %351 = vst [vmem:[%s681_s5 + $0x10] sm:$0xff] %v319_v32  ;;  %352 = vst [vmem:[%s681_s5 + $0x18] sm:$0xff] %v320_v35  ;;  %v328_v14 = vmax.f32 %v296_v6, 0.0  ;;  %v329_v15 = vmax.f32 %v297_v7, 0.0  ;;  %v330_v16 = vmax.f32 %v298_v8, 0.0  ;;  %v300_v17 = vadd.f32 %v639_v1, %v261_v9 }
  0x20   : > { %353 = vst [vmem:[%s681_s5 + $0x20] sm:$0xff] %v321_v36  ;;  %354 = vst [vmem:[%s681_s5 + $0x28] sm:$0xff] %v322_v37  ;;  %v331_v18 = vmax.f32 %v299_v13, 0.0  ;;  %v262_v19 = vmul.f32 %v627_v0, %v223_v44  ;;  %v263_v20 = vmul.f32 %v627_v0, %v224_v45  ;;  %v264_v21 = vmul.f32 %v627_v0, %v225_v46 }
  0x21   : > { %355 = vst [vmem:[%s681_s5 + $0x30] sm:$0xff] %v323_v40  ;;  %356 = vst [vmem:[%s681_s5 + $0x38] sm:$0xff] %v324_v54  ;;  %v332_v22 = vmax.f32 %v300_v17, 0.0  ;;  %v265_v23 = vmul.f32 %v627_v0, %v226_v47  ;;  %v266_v24 = vmul.f32 %v627_v0, %v227_v48  ;;  %v267_v25 = vmul.f32 %v627_v0, %v228_v49 }
  0x22   : > { %357 = vst [vmem:[%s681_s5 + $0x40] sm:$0xff] %v325_v10  ;;  %358 = vst [vmem:[%s681_s5 + $0x48] sm:$0xff] %v326_v11  ;;  %v301_v26 = vadd.f32 %v639_v1, %v262_v19  ;;  %v302_v27 = vadd.f32 %v639_v1, %v263_v20  ;;  %v303_v28 = vadd.f32 %v639_v1, %v264_v21 }
  0x23   : > { %359 = vst [vmem:[%s681_s5 + $0x50] sm:$0xff] %v327_v12  ;;  %360 = vst [vmem:[%s681_s5 + $0x58] sm:$0xff] %v328_v14  ;;  %v268_v29 = vmul.f32 %v627_v0, %v229_v50  ;;  %v304_v30 = vadd.f32 %v639_v1, %v265_v23  ;;  %v305_v31 = vadd.f32 %v639_v1, %v266_v24 }
  0x24   : > { %361 = vst [vmem:[%s681_s5 + $0x60] sm:$0xff] %v329_v15  ;;  %362 = vst [vmem:[%s681_s5 + $0x68] sm:$0xff] %v330_v16  ;;  %v306_v32 = vadd.f32 %v639_v1, %v267_v25  ;;  %v269_v33 = vmul.f32 %v627_v0, %v230_v51  ;;  %v333_v34 = vmax.f32 %v301_v26, 0.0  ;;  %v334_v35 = vmax.f32 %v302_v27, 0.0 }
  0x25   : > { %363 = vst [vmem:[%s681_s5 + $0x70] sm:$0xff] %v331_v18  ;;  %364 = vst [vmem:[%s681_s5 + $0x78] sm:$0xff] %v332_v22  ;;  %v335_v36 = vmax.f32 %v303_v28, 0.0  ;;  %v307_v37 = vadd.f32 %v639_v1, %v268_v29  ;;  %v336_v38 = vmax.f32 %v304_v30, 0.0  ;;  %v337_v39 = vmax.f32 %v305_v31, 0.0 }
  0x26   : > { %v338_v40 = vmax.f32 %v306_v32, 0.0  ;;  %v308_v41 = vadd.f32 %v639_v1, %v269_v33  ;;  %365 = vst [vmem:[%s681_s5 + $0x80] sm:$0xff] %v333_v34  ;;  %366 = vst [vmem:[%s681_s5 + $0x88] sm:$0xff] %v334_v35  ;;  %v270_v43 = vmul.f32 %v627_v0, %v692_v52  ;;  %v271_v44 = vmul.f32 %v627_v0, %v695_v53 }
  0x27   : > { %367 = vst [vmem:[%s681_s5 + $0x90] sm:$0xff] %v335_v36  ;;  %v339_v42 = vmax.f32 %v307_v37, 0.0  ;;  %v272_v45 = vmul.f32 %v627_v0, %v701_v58  ;;  %368 = vst [vmem:[%s681_s5 + $0x98] sm:$0xff] %v336_v38  ;;  %v273_v47 = vmul.f32 %v627_v0, %v704_v59  ;;  %v274_v48 = vmul.f32 %v627_v0, %v707_v60 }
  0x28   : > { %369 = vst [vmem:[%s681_s5 + $0xa0] sm:$0xff] %v337_v39  ;;  %370 = vst [vmem:[%s681_s5 + $0xa8] sm:$0xff] %v338_v40  ;;  %v340_v46 = vmax.f32 %v308_v41, 0.0  ;;  %v275_v49 = vmul.f32 %v627_v0, %v714_v3  ;;  %v309_v50 = vadd.f32 %v639_v1, %v270_v43  ;;  %v310_v51 = vadd.f32 %v639_v1, %v271_v44 }
  0x29   : > { %371 = vst [vmem:[%s681_s5 + $0xb0] sm:$0xff] %v339_v42  ;;  %v311_v52 = vadd.f32 %v639_v1, %v272_v45  ;;  %v276_v53 = vmul.f32 %v627_v0, %v717_v4  ;;  %v312_v54 = vadd.f32 %v639_v1, %v273_v47  ;;  %v313_v55 = vadd.f32 %v639_v1, %v274_v48 }
  0x2a   : > { %372 = vst [vmem:[%s681_s5 + $0xb8] sm:$0xff] %v340_v46  ;;  %v314_v56 = vadd.f32 %v639_v1, %v275_v49  ;;  %v277_v57 = vmul.f32 %v627_v0, %v720_v5  ;;  %v341_v58 = vmax.f32 %v309_v50, 0.0  ;;  %v342_v59 = vmax.f32 %v310_v51, 0.0 }
  0x2b   : > { %v343_v60 = vmax.f32 %v311_v52, 0.0  ;;  %v315_v61 = vadd.f32 %v639_v1, %v276_v53  ;;  %v344_v62 = vmax.f32 %v312_v54, 0.0  ;;  %v345_v63 = vmax.f32 %v313_v55, 0.0 }
  0x2c   : > { %v346_v2 = vmax.f32 %v314_v56, 0.0  ;;  %v316_v3 = vadd.f32 %v639_v1, %v277_v57  ;;  %373 = vst [vmem:[%s681_s5 + $0xc0] sm:$0xff] %v341_v58  ;;  %374 = vst [vmem:[%s681_s5 + $0xc8] sm:$0xff] %v342_v59 }
  0x2d   : > { %375 = vst [vmem:[%s681_s5 + $0xd0] sm:$0xff] %v343_v60  ;;  %v347_v4 = vmax.f32 %v315_v61, 0.0  ;;  %376 = vst [vmem:[%s681_s5 + $0xd8] sm:$0xff] %v344_v62 }
  0x2e   : > { %377 = vst [vmem:[%s681_s5 + $0xe0] sm:$0xff] %v345_v63  ;;  %378 = vst [vmem:[%s681_s5 + $0xe8] sm:$0xff] %v346_v2  ;;  %v348_v0 = vmax.f32 %v316_v3, 0.0 }
  0x2f   : > { %379 = vst [vmem:[%s681_s5 + $0xf0] sm:$0xff] %v347_v4 }
  0x30   : > { %380 = vst [vmem:[%s681_s5 + $0xf8] sm:$0xff] %v348_v0 }
  0x31 PF: > { %s13_s16 = sadd.s32 1, %s569_s16   ;;  %s819_s12 = smov %s561_s14 }
  0x32   : > { %p10_p7 = scmp.ge.s32.totalorder %s13_s16, 10   ;;  %s820_s13 = smov %s565_s15 }
  0x33   : > { %s821_s14 = smov %s824_s17  ;;  %s822_s15 = smov %s828_s18 }
  0x34   :  { %12 = sbr.rel (!%p10_p7) target bundleno = 3 (0x3), region = 62 }

</bundles_post_ra>
